<compile_context>
chip_gen: v5e
topology: v5e:2x2
jax: 0.10.0
libtpu: 0.0.40
codegen_flags: <defaults>
</compile_context>

<pallas_src>
import math
from functools import partial

import jax
import jax.numpy as jnp
from jax import lax
from jax.experimental import pallas as pl
from jax.experimental.pallas import tpu as pltpu

LN_EPS = 1e-5          # PyTorch nn.LayerNorm default
NEG_INF = -1e30        # finite mask sentinel (avoids inf-inf -> NaN)


def _layernorm(x, gamma, beta):
    mu = jnp.mean(x, axis=-1, keepdims=True)
    var = jnp.mean((x - mu) ** 2, axis=-1, keepdims=True)
    return (x - mu) * lax.rsqrt(var + LN_EPS) * gamma + beta


# ---------------------------------------------------------------------------
# Kernel 1: embedding scale + positional encoding + length mask
# ---------------------------------------------------------------------------
def embed_kernel(len_ref, emb_ref, pos_ref, out_ref, *, scale):
    b = pl.program_id(0)
    S = pos_ref.shape[0]
    row = lax.broadcasted_iota(jnp.int32, (S, 1), 0)
    qmask = (row < len_ref[b]).astype(jnp.float32)          # (S,1) -> lane bcast
    out_ref[0] = (emb_ref[0] * scale + pos_ref[...]) * qmask


def run_embed(emb, pos, lengths):
    B, S, E = emb.shape
    return pl.pallas_call(
        partial(embed_kernel, scale=math.sqrt(E)),
        out_shape=jax.ShapeDtypeStruct((B, S, E), jnp.float32),
        grid_spec=pltpu.PrefetchScalarGridSpec(
            num_scalar_prefetch=1,
            grid=(B,),
            in_specs=[
                pl.BlockSpec((1, S, E), lambda b, lens: (b, 0, 0)),
                pl.BlockSpec((S, E), lambda b, lens: (0, 0)),
            ],
            out_specs=pl.BlockSpec((1, S, E), lambda b, lens: (b, 0, 0)),
        ),
        compiler_params=pltpu.CompilerParams(dimension_semantics=("parallel",)),
    )(lengths, emb, pos)


# ---------------------------------------------------------------------------
# Kernel 2: Q/K/V projections (qkv_bias=False), bf16 MXU operands
# ---------------------------------------------------------------------------
def qkv_kernel(x_ref, wq_ref, wk_ref, wv_ref, q_ref, k_ref, v_ref):
    x = x_ref[0].astype(jnp.bfloat16)
    q_ref[0] = jnp.dot(x, wq_ref[...], preferred_element_type=jnp.float32)
    k_ref[0] = jnp.dot(x, wk_ref[...], preferred_element_type=jnp.float32)
    v_ref[0] = jnp.dot(x, wv_ref[...], preferred_element_type=jnp.float32)


def run_qkv(x, wq, wk, wv):
    B, S, E = x.shape
    D = wq.shape[1]
    out_sd = jax.ShapeDtypeStruct((B, S, D), jnp.float32)
    wspec = pl.BlockSpec((E, D), lambda b: (0, 0))
    return pl.pallas_call(
        qkv_kernel,
        out_shape=(out_sd, out_sd, out_sd),
        grid=(B,),
        in_specs=[pl.BlockSpec((1, S, E), lambda b: (b, 0, 0)), wspec, wspec, wspec],
        out_specs=(pl.BlockSpec((1, S, D), lambda b: (b, 0, 0)),) * 3,
        compiler_params=pltpu.CompilerParams(dimension_semantics=("parallel",)),
    )(x, wq, wk, wv)


# ---------------------------------------------------------------------------
# Kernel 3: attention — all heads of one batch element per grid step
#           (1/sqrt(head_dim) already folded into Wq on the host)
# ---------------------------------------------------------------------------
def attn_kernel(len_ref, q_ref, k_ref, v_ref, ctx_ref):
    b = pl.program_id(0)
    S = q_ref.shape[2]
    q = q_ref[0].astype(jnp.bfloat16)   # (H, S, hd)
    k = k_ref[0].astype(jnp.bfloat16)
    v = v_ref[0].astype(jnp.bfloat16)
    scores = jnp.einsum('hqd,hkd->hqk', q, k,
                        preferred_element_type=jnp.float32)        # (H,S,S) f32
    kpos = lax.broadcasted_iota(jnp.int32, (1, 1, S), 2)
    scores = jnp.where(kpos >= len_ref[b], NEG_INF, scores)
    m = jnp.max(scores, axis=-1, keepdims=True)
    e = jnp.exp(scores - m)
    inv_denom = pl.reciprocal(jnp.sum(e, axis=-1, keepdims=True), approx=True)
    attn = (e * inv_denom).astype(jnp.bfloat16)
    ctx_ref[0] = jnp.einsum('hqk,hkd->hqd', attn, v,
                            preferred_element_type=jnp.float32)


def run_attn(q4, k4, v4, lengths):
    B, H, S, hd = q4.shape
    spec = pl.BlockSpec((1, H, S, hd), lambda b, lens: (b, 0, 0, 0))
    return pl.pallas_call(
        attn_kernel,
        out_shape=jax.ShapeDtypeStruct((B, H, S, hd), jnp.float32),
        grid_spec=pltpu.PrefetchScalarGridSpec(
            num_scalar_prefetch=1,
            grid=(B,),
            in_specs=[spec, spec, spec],
            out_specs=spec,
        ),
        compiler_params=pltpu.CompilerParams(dimension_semantics=("parallel",)),
    )(lengths, q4, k4, v4)


# ---------------------------------------------------------------------------
# Kernel 4: out_proj + mask + residual, then FeedForward block
#           (pre-LN -> Linear -> ReLU -> Linear -> mask -> residual -> post-LN)
# ---------------------------------------------------------------------------
def post_kernel(len_ref, ctx_ref, x_ref, wo_ref, bo_ref,
                ln1g_ref, ln1b_ref, w1_ref, b1_ref, w2_ref, b2_ref,
                ln2g_ref, ln2b_ref, out_ref):
    b = pl.program_id(0)
    S = x_ref.shape[1]
    x = x_ref[0]
    ctx = ctx_ref[0].astype(jnp.bfloat16)

    row = lax.broadcasted_iota(jnp.int32, (S, 1), 0)
    qmask = (row < len_ref[b]).astype(jnp.float32)   # (S,1), reused twice

    out = jnp.dot(ctx, wo_ref[...], preferred_element_type=jnp.float32) + bo_ref[...]
    x1 = out * qmask + x                              # MHA skip connection

    nx = _layernorm(x1, ln1g_ref[...], ln1b_ref[...])
    h = jnp.maximum(
        jnp.dot(nx.astype(jnp.bfloat16), w1_ref[...],
                preferred_element_type=jnp.float32) + b1_ref[...], 0.0)
    f = jnp.dot(h.astype(jnp.bfloat16), w2_ref[...],
                preferred_element_type=jnp.float32) + b2_ref[...]
    out_ref[0] = _layernorm(f * qmask + x1, ln2g_ref[...], ln2b_ref[...])


def run_post(ctx, x, p, lengths):
    B, S, E = x.shape
    D = ctx.shape[2]
    F = p['w1'].shape[1]

    def full(shape):
        return pl.BlockSpec(shape, lambda b, lens: (0, 0))

    return pl.pallas_call(
        post_kernel,
        out_shape=jax.ShapeDtypeStruct((B, S, E), jnp.float32),
        grid_spec=pltpu.PrefetchScalarGridSpec(
            num_scalar_prefetch=1,
            grid=(B,),
            in_specs=[
                pl.BlockSpec((1, S, D), lambda b, lens: (b, 0, 0)),
                pl.BlockSpec((1, S, E), lambda b, lens: (b, 0, 0)),
                full((D, E)),  # wo (bf16)
                full((1, E)),  # bo
                full((1, E)),  # ln1 gamma
                full((1, E)),  # ln1 beta
                full((E, F)),  # w1 (bf16)
                full((1, F)),  # b1
                full((F, E)),  # w2 (bf16)
                full((1, E)),  # b2
                full((1, E)),  # ln2 gamma
                full((1, E)),  # ln2 beta
            ],
            out_specs=pl.BlockSpec((1, S, E), lambda b, lens: (b, 0, 0)),
        ),
        compiler_params=pltpu.CompilerParams(dimension_semantics=("parallel",)),
    )(lengths, ctx, x, p['wo'], p['bo'], p['ln1g'], p['ln1b'],
      p['w1'], p['b1'], p['w2'], p['b2'], p['ln2g'], p['ln2b'])


# ---------------------------------------------------------------------------
# Encoder stack (glue)
# ---------------------------------------------------------------------------
def prepare_layer_params(p, num_heads):
    """bf16 weights for the MXU; fold 1/sqrt(head_dim) into Wq."""
    D = p['wq'].shape[1]
    hd = D // num_heads
    b16 = lambda a: a.astype(jnp.bfloat16)
    return dict(
        wq=b16(p['wq'] * (1.0 / math.sqrt(hd))),
        wk=b16(p['wk']), wv=b16(p['wv']),
        wo=b16(p['wo']), bo=p['bo'],
        ln1g=p['ln1g'], ln1b=p['ln1b'],
        w1=b16(p['w1']), b1=p['b1'],
        w2=b16(p['w2']), b2=p['b2'],
        ln2g=p['ln2g'], ln2b=p['ln2b'],
    )


def encoder_layer(x, lengths, kp, num_heads):
    B, S, E = x.shape
    D = kp['wq'].shape[1]
    hd = D // num_heads
    q, k, v = run_qkv(x, kp['wq'], kp['wk'], kp['wv'])
    # Reproduce PyTorch `.view(batch, num_heads, seq_len, head_dim)` exactly
    # (row-major re-view, NO transpose) — a zero-copy bitcast in XLA.
    q4 = q.reshape(B, num_heads, S, hd)
    k4 = k.reshape(B, num_heads, S, hd)
    v4 = v.reshape(B, num_heads, S, hd)
    ctx = run_attn(q4, k4, v4, lengths)
    ctx2 = ctx.reshape(B, S, D)  # `.contiguous().view(batch, seq_len, -1)` (bitcast)
    return run_post(ctx2, x, kp, lengths)


@partial(jax.jit, static_argnames=("num_heads",))
def encoder_blocks_forward(tokens, lengths, params, num_heads):
    S = tokens.shape[1]
    emb = params['emb'][tokens]           # embedding gather (glue)
    x = run_embed(emb, params['pos'][:S], lengths)
    for p in params['layers']:
        kp = prepare_layer_params(p, num_heads)
        x = encoder_layer(x, lengths, kp, num_heads)
    return x


# ---------------------------------------------------------------------------
# Deterministic parameter init (matches module __init__ shapes; weights stored
# pre-transposed as (in, out) so kernels compute x @ W).
# ---------------------------------------------------------------------------
def init_params(key, vocab, E, D, F, num_layers, max_len=1000, pad_token=0):
    keys = jax.random.split(key, 1 + num_layers)
    emb = jax.random.normal(keys[0], (vocab, E), jnp.float32) * 0.1
    emb = emb.at[pad_token].set(0.0)  # padding_idx=PAD_token

    pos_idx = jnp.arange(max_len, dtype=jnp.float32)[:, None]
    i = jnp.arange(0, E, 2, dtype=jnp.float32)
    denom = jnp.power(10000.0, i / E)
    angle = pos_idx / denom
    pe = jnp.zeros((max_len, E), jnp.float32)
    pe = pe.at[:, 0::2].set(jnp.sin(angle)).at[:, 1::2].set(jnp.cos(angle))

    def nrm(kk, shape, s=0.05):
        return jax.random.normal(kk, shape, jnp.float32) * s

    layers = []
    for l in range(num_layers):
        k = jax.random.split(keys[1 + l], 12)
        layers.append(dict(
            wq=nrm(k[0], (E, D)), wk=nrm(k[1], (E, D)), wv=nrm(k[2], (E, D)),
            wo=nrm(k[3], (D, E)), bo=nrm(k[4], (1, E), 0.02),
            w1=nrm(k[5], (E, F)), b1=nrm(k[6], (1, F), 0.02),
            w2=nrm(k[7], (F, E)), b2=nrm(k[8], (1, E), 0.02),
            ln1g=1.0 + nrm(k[9], (1, E), 0.02), ln1b=nrm(k[10], (1, E), 0.02),
            ln2g=1.0 + nrm(k[11], (1, E), 0.02), ln2b=jnp.zeros((1, E), jnp.float32),
        ))
    return dict(emb=emb, pos=pe, layers=layers)


# ---------------------------------------------------------------------------
# Pure-JAX f32 reference (for verification)
# ---------------------------------------------------------------------------
def reference_forward(tokens, lengths, params, num_heads):
    E = params['emb'].shape[1]
    B, S = tokens.shape
    x = params['emb'][tokens] * math.sqrt(E) + params['pos'][:S][None]
    mask = (jnp.arange(S)[None, :] < lengths[:, None])[..., None]
    x = x * mask

    def ln(z, g, b):
        mu = z.mean(-1, keepdims=True)
        var = ((z - mu) ** 2).mean(-1, keepdims=True)
        return (z - mu) / jnp.sqrt(var + LN_EPS) * g + b

    for p in params['layers']:
        D = p['wq'].shape[1]
        hd = D // num_heads
        q = (x @ p['wq']).reshape(B, num_heads, S, hd)
        k = (x @ p['wk']).reshape(B, num_heads, S, hd)
        v = (x @ p['wv']).reshape(B, num_heads, S, hd)
        scores = jnp.einsum('bhqd,bhkd->bhqk', q, k) / math.sqrt(hd)
        pad = (jnp.arange(S)[None, :] >= lengths[:, None])[:, None, None, :]
        scores = jnp.where(pad, -jnp.inf, scores)
        attn = jax.nn.softmax(scores, axis=-1)
        ctx = jnp.einsum('bhqk,bhkd->bhqd', attn, v).reshape(B, S, D)
        out = (ctx @ p['wo'] + p['bo']) * mask
        x1 = out + x
        nx = ln(x1, p['ln1g'], p['ln1b'])
        f = (jax.nn.relu(nx @ p['w1'] + p['b1']) @ p['w2'] + p['b2']) * mask
        x = ln(f + x1, p['ln2g'], p['ln2b'])
    return x


if __name__ == "__main__":
    # small config consistent with EncoderBlocks(__init__)
    B, S = 2, 8
    vocab, E, D, num_heads, F, num_layers = 50, 32, 32, 4, 64, 2

    key = jax.random.PRNGKey(0)
    kp, kt = jax.random.split(key)
    params = init_params(kp, vocab, E, D, F, num_layers)

    lengths = jnp.array([8, 5], dtype=jnp.int32)
    tokens = jax.random.randint(kt, (B, S), 1, vocab, dtype=jnp.int32)
    tokens = jnp.where(jnp.arange(S)[None, :] < lengths[:, None], tokens, 0)

    out = encoder_blocks_forward(tokens, lengths, params, num_heads=num_heads)
    out = jax.block_until_ready(out)
    assert out.shape == (B, S, E)

    ref = reference_forward(tokens, lengths, params, num_heads)
    max_err = float(jnp.max(jnp.abs(out - ref)))
    assert jnp.allclose(out, ref, atol=3e-2, rtol=3e-2), f"max_err={max_err}"

    print("KERNEL_OK")
</pallas_src>

<mosaic_0001>
module attributes {stable_mosaic.version = 11 : i64} {
  func.func @embed_kernel(%arg0: i32, %arg1: memref<2xi32, #tpu.memory_space<smem>>, %arg2: memref<1x8x32xf32, #tpu.memory_space<vmem>>, %arg3: memref<8x32xf32, #tpu.memory_space<vmem>>, %arg4: memref<1x8x32xf32, #tpu.memory_space<vmem>>) attributes {dimension_semantics = [#tpu.dimension_semantics<parallel>], iteration_bounds = array<i64: 2>, scalar_prefetch = 1 : i64, scratch_operands = 0 : i64, tpu.core_type = #tpu.core_type<tc>, window_params = [{transform_indices = @transform_0, window_bounds = array<i64: 1, 8, 32>}, {pipeline_mode = #tpu.pipeline_mode<synchronous>, transform_indices = @transform_1, window_bounds = array<i64: 8, 32>}, {transform_indices = @transform_2, window_bounds = array<i64: 1, 8, 32>}]} {
    %0 = tpu.iota {dimensions = array<i32: 0>} : vector<8x1xi32>
    %1 = arith.index_cast %arg0 : i32 to index
    %2 = memref.load %arg1[%1] : memref<2xi32, #tpu.memory_space<smem>>
    %3 = vector.broadcast %2 : i32 to vector<8x1xi32>
    %4 = arith.cmpi slt, %0, %3 : vector<8x1xi32>
    %5 = arith.extui %4 : vector<8x1xi1> to vector<8x1xi32>
    %6 = arith.sitofp %5 : vector<8x1xi32> to vector<8x1xf32>
    %c0 = arith.constant 0 : index
    %c0_0 = arith.constant 0 : index
    %c0_1 = arith.constant 0 : index
    %7 = vector.load %arg2[%c0, %c0_0, %c0_1] : memref<1x8x32xf32, #tpu.memory_space<vmem>>, vector<1x8x32xf32>
    %8 = vector.shape_cast %7 : vector<1x8x32xf32> to vector<8x32xf32>
    %cst = arith.constant 5.65685415 : f32
    %9 = vector.broadcast %cst : f32 to vector<8x32xf32>
    %10 = arith.mulf %8, %9 : vector<8x32xf32>
    %c0_2 = arith.constant 0 : index
    %c0_3 = arith.constant 0 : index
    %11 = vector.load %arg3[%c0_2, %c0_3] : memref<8x32xf32, #tpu.memory_space<vmem>>, vector<8x32xf32>
    %12 = arith.addf %10, %11 : vector<8x32xf32>
    %13 = vector.broadcast %6 : vector<8x1xf32> to vector<8x32xf32>
    %14 = arith.mulf %12, %13 : vector<8x32xf32>
    %c0_4 = arith.constant 0 : index
    %c0_5 = arith.constant 0 : index
    %c0_6 = arith.constant 0 : index
    %15 = vector.load %arg4[%c0_4, %c0_5, %c0_6] : memref<1x8x32xf32, #tpu.memory_space<vmem>>, vector<1x8x32xf32>
    %16 = vector.shape_cast %15 : vector<1x8x32xf32> to vector<8x32xf32>
    %17 = vector.shape_cast %14 : vector<8x32xf32> to vector<1x8x32xf32>
    tpu.vector_store %arg4[%c0_4, %c0_5, %c0_6], %17 {strides = array<i32>} : memref<1x8x32xf32, #tpu.memory_space<vmem>>, vector<1x8x32xf32>,
    return
  }
  func.func @transform_0(%arg0: i32, %arg1: memref<2xi32, #tpu.memory_space<smem>>) -> (i32, i32, i32) {
    %c0_i32 = arith.constant 0 : i32
    %c0_i32_0 = arith.constant 0 : i32
    %c0_i32_1 = arith.constant 0 : i32
    return %arg0, %c0_i32, %c0_i32_0 : i32, i32, i32
  }
  func.func @transform_1(%arg0: i32, %arg1: memref<2xi32, #tpu.memory_space<smem>>) -> (i32, i32) {
    %c0_i32 = arith.constant 0 : i32
    %c0_i32_0 = arith.constant 0 : i32
    %c0_i32_1 = arith.constant 0 : i32
    return %c0_i32, %c0_i32_0 : i32, i32
  }
  func.func @transform_2(%arg0: i32, %arg1: memref<2xi32, #tpu.memory_space<smem>>) -> (i32, i32, i32) {
    %c0_i32 = arith.constant 0 : i32
    %c0_i32_0 = arith.constant 0 : i32
    %c0_i32_1 = arith.constant 0 : i32
    return %arg0, %c0_i32, %c0_i32_0 : i32, i32, i32
  }
}

module attributes {stable_mosaic.version = 11 : i64} {
  func.func @qkv_kernel(%arg0: i32, %arg1: memref<1x8x32xf32, #tpu.memory_space<vmem>>, %arg2: memref<32x32xbf16, #tpu.memory_space<vmem>>, %arg3: memref<32x32xbf16, #tpu.memory_space<vmem>>, %arg4: memref<32x32xbf16, #tpu.memory_space<vmem>>, %arg5: memref<1x8x32xf32, #tpu.memory_space<vmem>>, %arg6: memref<1x8x32xf32, #tpu.memory_space<vmem>>, %arg7: memref<1x8x32xf32, #tpu.memory_space<vmem>>) attributes {dimension_semantics = [#tpu.dimension_semantics<parallel>], iteration_bounds = array<i64: 2>, scalar_prefetch = 0 : i64, scratch_operands = 0 : i64, tpu.core_type = #tpu.core_type<tc>, window_params = [{transform_indices = @transform_0, window_bounds = array<i64: 1, 8, 32>}, {pipeline_mode = #tpu.pipeline_mode<synchronous>, transform_indices = @transform_1, window_bounds = array<i64: 32, 32>}, {pipeline_mode = #tpu.pipeline_mode<synchronous>, transform_indices = @transform_2, window_bounds = array<i64: 32, 32>}, {pipeline_mode = #tpu.pipeline_mode<synchronous>, transform_indices = @transform_3, window_bounds = array<i64: 32, 32>}, {transform_indices = @transform_4, window_bounds = array<i64: 1, 8, 32>}, {transform_indices = @transform_5, window_bounds = array<i64: 1, 8, 32>}, {transform_indices = @transform_6, window_bounds = array<i64: 1, 8, 32>}]} {
    %c0 = arith.constant 0 : index
    %c0_0 = arith.constant 0 : index
    %c0_1 = arith.constant 0 : index
    %0 = vector.load %arg1[%c0, %c0_0, %c0_1] : memref<1x8x32xf32, #tpu.memory_space<vmem>>, vector<1x8x32xf32>
    %1 = vector.shape_cast %0 : vector<1x8x32xf32> to vector<8x32xf32>
    %2 = arith.truncf %1 : vector<8x32xf32> to vector<8x32xbf16>
    %c0_2 = arith.constant 0 : index
    %c0_3 = arith.constant 0 : index
    %3 = vector.load %arg2[%c0_2, %c0_3] : memref<32x32xbf16, #tpu.memory_space<vmem>>, vector<32x32xbf16>
    %cst = arith.constant dense<0.000000e+00> : vector<8x32xf32>
    %4 = tpu.matmul %2, %3, %cst {dimension_numbers = #tpu.dot_dimension_numbers<[1], [0], [0], [1], [0, 0, 1, 1], [], []>} : vector<8x32xbf16>, vector<32x32xbf16>, vector<8x32xf32> -> vector<8x32xf32>
    %c0_4 = arith.constant 0 : index
    %c0_5 = arith.constant 0 : index
    %c0_6 = arith.constant 0 : index
    %5 = vector.load %arg5[%c0_4, %c0_5, %c0_6] : memref<1x8x32xf32, #tpu.memory_space<vmem>>, vector<1x8x32xf32>
    %6 = vector.shape_cast %5 : vector<1x8x32xf32> to vector<8x32xf32>
    %7 = vector.shape_cast %4 : vector<8x32xf32> to vector<1x8x32xf32>
    tpu.vector_store %arg5[%c0_4, %c0_5, %c0_6], %7 {strides = array<i32>} : memref<1x8x32xf32, #tpu.memory_space<vmem>>, vector<1x8x32xf32>,
    %c0_7 = arith.constant 0 : index
    %c0_8 = arith.constant 0 : index
    %8 = vector.load %arg3[%c0_7, %c0_8] : memref<32x32xbf16, #tpu.memory_space<vmem>>, vector<32x32xbf16>
    %cst_9 = arith.constant dense<0.000000e+00> : vector<8x32xf32>
    %9 = tpu.matmul %2, %8, %cst_9 {dimension_numbers = #tpu.dot_dimension_numbers<[1], [0], [0], [1], [0, 0, 1, 1], [], []>} : vector<8x32xbf16>, vector<32x32xbf16>, vector<8x32xf32> -> vector<8x32xf32>
    %c0_10 = arith.constant 0 : index
    %c0_11 = arith.constant 0 : index
    %c0_12 = arith.constant 0 : index
    %10 = vector.load %arg6[%c0_10, %c0_11, %c0_12] : memref<1x8x32xf32, #tpu.memory_space<vmem>>, vector<1x8x32xf32>
    %11 = vector.shape_cast %10 : vector<1x8x32xf32> to vector<8x32xf32>
    %12 = vector.shape_cast %9 : vector<8x32xf32> to vector<1x8x32xf32>
    tpu.vector_store %arg6[%c0_10, %c0_11, %c0_12], %12 {strides = array<i32>} : memref<1x8x32xf32, #tpu.memory_space<vmem>>, vector<1x8x32xf32>,
    %c0_13 = arith.constant 0 : index
    %c0_14 = arith.constant 0 : index
    %13 = vector.load %arg4[%c0_13, %c0_14] : memref<32x32xbf16, #tpu.memory_space<vmem>>, vector<32x32xbf16>
    %cst_15 = arith.constant dense<0.000000e+00> : vector<8x32xf32>
    %14 = tpu.matmul %2, %13, %cst_15 {dimension_numbers = #tpu.dot_dimension_numbers<[1], [0], [0], [1], [0, 0, 1, 1], [], []>} : vector<8x32xbf16>, vector<32x32xbf16>, vector<8x32xf32> -> vector<8x32xf32>
    %c0_16 = arith.constant 0 : index
    %c0_17 = arith.constant 0 : index
    %c0_18 = arith.constant 0 : index
    %15 = vector.load %arg7[%c0_16, %c0_17, %c0_18] : memref<1x8x32xf32, #tpu.memory_space<vmem>>, vector<1x8x32xf32>
    %16 = vector.shape_cast %15 : vector<1x8x32xf32> to vector<8x32xf32>
    %17 = vector.shape_cast %14 : vector<8x32xf32> to vector<1x8x32xf32>
    tpu.vector_store %arg7[%c0_16, %c0_17, %c0_18], %17 {strides = array<i32>} : memref<1x8x32xf32, #tpu.memory_space<vmem>>, vector<1x8x32xf32>,
    return
  }
  func.func @transform_0(%arg0: i32) -> (i32, i32, i32) {
    %c0_i32 = arith.constant 0 : i32
    %c0_i32_0 = arith.constant 0 : i32
    %c0_i32_1 = arith.constant 0 : i32
    return %arg0, %c0_i32, %c0_i32_0 : i32, i32, i32
  }
  func.func @transform_1(%arg0: i32) -> (i32, i32) {
    %c0_i32 = arith.constant 0 : i32
    %c0_i32_0 = arith.constant 0 : i32
    %c0_i32_1 = arith.constant 0 : i32
    return %c0_i32, %c0_i32_0 : i32, i32
  }
  func.func @transform_2(%arg0: i32) -> (i32, i32) {
    %c0_i32 = arith.constant 0 : i32
    %c0_i32_0 = arith.constant 0 : i32
    %c0_i32_1 = arith.constant 0 : i32
    return %c0_i32, %c0_i32_0 : i32, i32
  }
  func.func @transform_3(%arg0: i32) -> (i32, i32) {
    %c0_i32 = arith.constant 0 : i32
    %c0_i32_0 = arith.constant 0 : i32
    %c0_i32_1 = arith.constant 0 : i32
    return %c0_i32, %c0_i32_0 : i32, i32
  }
  func.func @transform_4(%arg0: i32) -> (i32, i32, i32) {
    %c0_i32 = arith.constant 0 : i32
    %c0_i32_0 = arith.constant 0 : i32
    %c0_i32_1 = arith.constant 0 : i32
    return %arg0, %c0_i32, %c0_i32_0 : i32, i32, i32
  }
  func.func @transform_5(%arg0: i32) -> (i32, i32, i32) {
    %c0_i32 = arith.constant 0 : i32
    %c0_i32_0 = arith.constant 0 : i32
    %c0_i32_1 = arith.constant 0 : i32
    return %arg0, %c0_i32, %c0_i32_0 : i32, i32, i32
  }
  func.func @transform_6(%arg0: i32) -> (i32, i32, i32) {
    %c0_i32 = arith.constant 0 : i32
    %c0_i32_0 = arith.constant 0 : i32
    %c0_i32_1 = arith.constant 0 : i32
    return %arg0, %c0_i32, %c0_i32_0 : i32, i32, i32
  }
}

module attributes {stable_mosaic.version = 11 : i64} {
  func.func @post_kernel(%arg0: i32, %arg1: memref<2xi32, #tpu.memory_space<smem>>, %arg2: memref<1x8x32xf32, #tpu.memory_space<vmem>>, %arg3: memref<1x8x32xf32, #tpu.memory_space<vmem>>, %arg4: memref<32x32xbf16, #tpu.memory_space<vmem>>, %arg5: memref<1x32xf32, #tpu.memory_space<vmem>>, %arg6: memref<1x32xf32, #tpu.memory_space<vmem>>, %arg7: memref<1x32xf32, #tpu.memory_space<vmem>>, %arg8: memref<32x64xbf16, #tpu.memory_space<vmem>>, %arg9: memref<1x64xf32, #tpu.memory_space<vmem>>, %arg10: memref<64x32xbf16, #tpu.memory_space<vmem>>, %arg11: memref<1x32xf32, #tpu.memory_space<vmem>>, %arg12: memref<1x32xf32, #tpu.memory_space<vmem>>, %arg13: memref<1x32xf32, #tpu.memory_space<vmem>>, %arg14: memref<1x8x32xf32, #tpu.memory_space<vmem>>) attributes {dimension_semantics = [#tpu.dimension_semantics<parallel>], iteration_bounds = array<i64: 2>, scalar_prefetch = 1 : i64, scratch_operands = 0 : i64, tpu.core_type = #tpu.core_type<tc>, window_params = [{transform_indices = @transform_0, window_bounds = array<i64: 1, 8, 32>}, {transform_indices = @transform_1, window_bounds = array<i64: 1, 8, 32>}, {pipeline_mode = #tpu.pipeline_mode<synchronous>, transform_indices = @transform_2, window_bounds = array<i64: 32, 32>}, {pipeline_mode = #tpu.pipeline_mode<synchronous>, transform_indices = @transform_3, window_bounds = array<i64: 1, 32>}, {pipeline_mode = #tpu.pipeline_mode<synchronous>, transform_indices = @transform_4, window_bounds = array<i64: 1, 32>}, {pipeline_mode = #tpu.pipeline_mode<synchronous>, transform_indices = @transform_5, window_bounds = array<i64: 1, 32>}, {pipeline_mode = #tpu.pipeline_mode<synchronous>, transform_indices = @transform_6, window_bounds = array<i64: 32, 64>}, {pipeline_mode = #tpu.pipeline_mode<synchronous>, transform_indices = @transform_7, window_bounds = array<i64: 1, 64>}, {pipeline_mode = #tpu.pipeline_mode<synchronous>, transform_indices = @transform_8, window_bounds = array<i64: 64, 32>}, {pipeline_mode = #tpu.pipeline_mode<synchronous>, transform_indices = @transform_9, window_bounds = array<i64: 1, 32>}, {pipeline_mode = #tpu.pipeline_mode<synchronous>, transform_indices = @transform_10, window_bounds = array<i64: 1, 32>}, {pipeline_mode = #tpu.pipeline_mode<synchronous>, transform_indices = @transform_11, window_bounds = array<i64: 1, 32>}, {transform_indices = @transform_12, window_bounds = array<i64: 1, 8, 32>}]} {
    %c0 = arith.constant 0 : index
    %c0_0 = arith.constant 0 : index
    %c0_1 = arith.constant 0 : index
    %0 = vector.load %arg3[%c0, %c0_0, %c0_1] : memref<1x8x32xf32, #tpu.memory_space<vmem>>, vector<1x8x32xf32>
    %1 = vector.shape_cast %0 : vector<1x8x32xf32> to vector<8x32xf32>
    %c0_2 = arith.constant 0 : index
    %c0_3 = arith.constant 0 : index
    %c0_4 = arith.constant 0 : index
    %2 = vector.load %arg2[%c0_2, %c0_3, %c0_4] : memref<1x8x32xf32, #tpu.memory_space<vmem>>, vector<1x8x32xf32>
    %3 = vector.shape_cast %2 : vector<1x8x32xf32> to vector<8x32xf32>
    %4 = arith.truncf %3 : vector<8x32xf32> to vector<8x32xbf16>
    %5 = tpu.iota {dimensions = array<i32: 0>} : vector<8x1xi32>
    %6 = arith.index_cast %arg0 : i32 to index
    %7 = memref.load %arg1[%6] : memref<2xi32, #tpu.memory_space<smem>>
    %8 = vector.broadcast %7 : i32 to vector<8x1xi32>
    %9 = arith.cmpi slt, %5, %8 : vector<8x1xi32>
    %10 = arith.extui %9 : vector<8x1xi1> to vector<8x1xi32>
    %11 = arith.sitofp %10 : vector<8x1xi32> to vector<8x1xf32>
    %c0_5 = arith.constant 0 : index
    %c0_6 = arith.constant 0 : index
    %12 = vector.load %arg4[%c0_5, %c0_6] : memref<32x32xbf16, #tpu.memory_space<vmem>>, vector<32x32xbf16>
    %cst = arith.constant dense<0.000000e+00> : vector<8x32xf32>
    %13 = tpu.matmul %4, %12, %cst {dimension_numbers = #tpu.dot_dimension_numbers<[1], [0], [0], [1], [0, 0, 1, 1], [], []>} : vector<8x32xbf16>, vector<32x32xbf16>, vector<8x32xf32> -> vector<8x32xf32>
    %c0_7 = arith.constant 0 : index
    %c0_8 = arith.constant 0 : index
    %14 = vector.load %arg5[%c0_7, %c0_8] : memref<1x32xf32, #tpu.memory_space<vmem>>, vector<1x32xf32>
    %15 = vector.broadcast %14 : vector<1x32xf32> to vector<8x32xf32>
    %16 = arith.addf %13, %15 : vector<8x32xf32>
    %17 = vector.broadcast %11 : vector<8x1xf32> to vector<8x32xf32>
    %18 = arith.mulf %16, %17 : vector<8x32xf32>
    %19 = arith.addf %18, %1 : vector<8x32xf32>
    %c0_9 = arith.constant 0 : index
    %c0_10 = arith.constant 0 : index
    %20 = vector.load %arg6[%c0_9, %c0_10] : memref<1x32xf32, #tpu.memory_space<vmem>>, vector<1x32xf32>
    %c0_11 = arith.constant 0 : index
    %c0_12 = arith.constant 0 : index
    %21 = vector.load %arg7[%c0_11, %c0_12] : memref<1x32xf32, #tpu.memory_space<vmem>>, vector<1x32xf32>
    %cst_13 = arith.constant dense<0.000000e+00> : vector<8xf32>
    %22 = vector.multi_reduction <add>, %19, %cst_13 [1] : vector<8x32xf32> to vector<8xf32>
    %23 = vector.shape_cast %22 : vector<8xf32> to vector<8x1xf32>
    %cst_14 = arith.constant 3.200000e+01 : f32
    %24 = vector.broadcast %cst_14 : f32 to vector<8x1xf32>
    %25 = arith.divf %23, %24 : vector<8x1xf32>
    %26 = vector.broadcast %25 : vector<8x1xf32> to vector<8x32xf32>
    %27 = arith.subf %19, %26 : vector<8x32xf32>
    %28 = arith.mulf %27, %27 : vector<8x32xf32>
    %cst_15 = arith.constant dense<0.000000e+00> : vector<8xf32>
    %29 = vector.multi_reduction <add>, %28, %cst_15 [1] : vector<8x32xf32> to vector<8xf32>
    %30 = vector.shape_cast %29 : vector<8xf32> to vector<8x1xf32>
    %cst_16 = arith.constant 3.200000e+01 : f32
    %31 = vector.broadcast %cst_16 : f32 to vector<8x1xf32>
    %32 = arith.divf %30, %31 : vector<8x1xf32>
    %33 = vector.broadcast %25 : vector<8x1xf32> to vector<8x32xf32>
    %34 = arith.subf %19, %33 : vector<8x32xf32>
    %cst_17 = arith.constant 9.99999974E-6 : f32
    %35 = vector.broadcast %cst_17 : f32 to vector<8x1xf32>
    %36 = arith.addf %32, %35 : vector<8x1xf32>
    %37 = math.rsqrt %36 : vector<8x1xf32>
    %38 = vector.broadcast %37 : vector<8x1xf32> to vector<8x32xf32>
    %39 = arith.mulf %34, %38 : vector<8x32xf32>
    %40 = vector.broadcast %20 : vector<1x32xf32> to vector<8x32xf32>
    %41 = arith.mulf %39, %40 : vector<8x32xf32>
    %42 = vector.broadcast %21 : vector<1x32xf32> to vector<8x32xf32>
    %43 = arith.addf %41, %42 : vector<8x32xf32>
    %44 = arith.truncf %43 : vector<8x32xf32> to vector<8x32xbf16>
    %c0_18 = arith.constant 0 : index
    %c0_19 = arith.constant 0 : index
    %45 = vector.load %arg8[%c0_18, %c0_19] : memref<32x64xbf16, #tpu.memory_space<vmem>>, vector<32x64xbf16>
    %cst_20 = arith.constant dense<0.000000e+00> : vector<8x64xf32>
    %46 = tpu.matmul %44, %45, %cst_20 {dimension_numbers = #tpu.dot_dimension_numbers<[1], [0], [0], [1], [0, 0, 1, 1], [], []>} : vector<8x32xbf16>, vector<32x64xbf16>, vector<8x64xf32> -> vector<8x64xf32>
    %c0_21 = arith.constant 0 : index
    %c0_22 = arith.constant 0 : index
    %47 = vector.load %arg9[%c0_21, %c0_22] : memref<1x64xf32, #tpu.memory_space<vmem>>, vector<1x64xf32>
    %48 = vector.broadcast %47 : vector<1x64xf32> to vector<8x64xf32>
    %49 = arith.addf %46, %48 : vector<8x64xf32>
    %cst_23 = arith.constant 0.000000e+00 : f32
    %50 = vector.broadcast %cst_23 : f32 to vector<8x64xf32>
    %51 = arith.maximumf %49, %50 : vector<8x64xf32>
    %52 = arith.truncf %51 : vector<8x64xf32> to vector<8x64xbf16>
    %c0_24 = arith.constant 0 : index
    %c0_25 = arith.constant 0 : index
    %53 = vector.load %arg10[%c0_24, %c0_25] : memref<64x32xbf16, #tpu.memory_space<vmem>>, vector<64x32xbf16>
    %cst_26 = arith.constant dense<0.000000e+00> : vector<8x32xf32>
    %54 = tpu.matmul %52, %53, %cst_26 {dimension_numbers = #tpu.dot_dimension_numbers<[1], [0], [0], [1], [0, 0, 1, 1], [], []>} : vector<8x64xbf16>, vector<64x32xbf16>, vector<8x32xf32> -> vector<8x32xf32>
    %c0_27 = arith.constant 0 : index
    %c0_28 = arith.constant 0 : index
    %55 = vector.load %arg11[%c0_27, %c0_28] : memref<1x32xf32, #tpu.memory_space<vmem>>, vector<1x32xf32>
    %56 = vector.broadcast %55 : vector<1x32xf32> to vector<8x32xf32>
    %57 = arith.addf %54, %56 : vector<8x32xf32>
    %58 = vector.broadcast %11 : vector<8x1xf32> to vector<8x32xf32>
    %59 = arith.mulf %57, %58 : vector<8x32xf32>
    %60 = arith.addf %59, %19 : vector<8x32xf32>
    %c0_29 = arith.constant 0 : index
    %c0_30 = arith.constant 0 : index
    %61 = vector.load %arg12[%c0_29, %c0_30] : memref<1x32xf32, #tpu.memory_space<vmem>>, vector<1x32xf32>
    %c0_31 = arith.constant 0 : index
    %c0_32 = arith.constant 0 : index
    %62 = vector.load %arg13[%c0_31, %c0_32] : memref<1x32xf32, #tpu.memory_space<vmem>>, vector<1x32xf32>
    %cst_33 = arith.constant dense<0.000000e+00> : vector<8xf32>
    %63 = vector.multi_reduction <add>, %60, %cst_33 [1] : vector<8x32xf32> to vector<8xf32>
    %64 = vector.shape_cast %63 : vector<8xf32> to vector<8x1xf32>
    %cst_34 = arith.constant 3.200000e+01 : f32
    %65 = vector.broadcast %cst_34 : f32 to vector<8x1xf32>
    %66 = arith.divf %64, %65 : vector<8x1xf32>
    %67 = vector.broadcast %66 : vector<8x1xf32> to vector<8x32xf32>
    %68 = arith.subf %60, %67 : vector<8x32xf32>
    %69 = arith.mulf %68, %68 : vector<8x32xf32>
    %cst_35 = arith.constant dense<0.000000e+00> : vector<8xf32>
    %70 = vector.multi_reduction <add>, %69, %cst_35 [1] : vector<8x32xf32> to vector<8xf32>
    %71 = vector.shape_cast %70 : vector<8xf32> to vector<8x1xf32>
    %cst_36 = arith.constant 3.200000e+01 : f32
    %72 = vector.broadcast %cst_36 : f32 to vector<8x1xf32>
    %73 = arith.divf %71, %72 : vector<8x1xf32>
    %74 = vector.broadcast %66 : vector<8x1xf32> to vector<8x32xf32>
    %75 = arith.subf %60, %74 : vector<8x32xf32>
    %cst_37 = arith.constant 9.99999974E-6 : f32
    %76 = vector.broadcast %cst_37 : f32 to vector<8x1xf32>
    %77 = arith.addf %73, %76 : vector<8x1xf32>
    %78 = math.rsqrt %77 : vector<8x1xf32>
    %79 = vector.broadcast %78 : vector<8x1xf32> to vector<8x32xf32>
    %80 = arith.mulf %75, %79 : vector<8x32xf32>
    %81 = vector.broadcast %61 : vector<1x32xf32> to vector<8x32xf32>
    %82 = arith.mulf %80, %81 : vector<8x32xf32>
    %83 = vector.broadcast %62 : vector<1x32xf32> to vector<8x32xf32>
    %84 = arith.addf %82, %83 : vector<8x32xf32>
    %c0_38 = arith.constant 0 : index
    %c0_39 = arith.constant 0 : index
    %c0_40 = arith.constant 0 : index
    %85 = vector.load %arg14[%c0_38, %c0_39, %c0_40] : memref<1x8x32xf32, #tpu.memory_space<vmem>>, vector<1x8x32xf32>
    %86 = vector.shape_cast %85 : vector<1x8x32xf32> to vector<8x32xf32>
    %87 = vector.shape_cast %84 : vector<8x32xf32> to vector<1x8x32xf32>
    tpu.vector_store %arg14[%c0_38, %c0_39, %c0_40], %87 {strides = array<i32>} : memref<1x8x32xf32, #tpu.memory_space<vmem>>, vector<1x8x32xf32>,
    return
  }
  func.func @transform_0(%arg0: i32, %arg1: memref<2xi32, #tpu.memory_space<smem>>) -> (i32, i32, i32) {
    %c0_i32 = arith.constant 0 : i32
    %c0_i32_0 = arith.constant 0 : i32
    %c0_i32_1 = arith.constant 0 : i32
    return %arg0, %c0_i32, %c0_i32_0 : i32, i32, i32
  }
  func.func @transform_1(%arg0: i32, %arg1: memref<2xi32, #tpu.memory_space<smem>>) -> (i32, i32, i32) {
    %c0_i32 = arith.constant 0 : i32
    %c0_i32_0 = arith.constant 0 : i32
    %c0_i32_1 = arith.constant 0 : i32
    return %arg0, %c0_i32, %c0_i32_0 : i32, i32, i32
  }
  func.func @transform_2(%arg0: i32, %arg1: memref<2xi32, #tpu.memory_space<smem>>) -> (i32, i32) {
    %c0_i32 = arith.constant 0 : i32
    %c0_i32_0 = arith.constant 0 : i32
    %c0_i32_1 = arith.constant 0 : i32
    return %c0_i32, %c0_i32_0 : i32, i32
  }
  func.func @transform_3(%arg0: i32, %arg1: memref<2xi32, #tpu.memory_space<smem>>) -> (i32, i32) {
    %c0_i32 = arith.constant 0 : i32
    %c0_i32_0 = arith.constant 0 : i32
    %c0_i32_1 = arith.constant 0 : i32
    return %c0_i32, %c0_i32_0 : i32, i32
  }
  func.func @transform_4(%arg0: i32, %arg1: memref<2xi32, #tpu.memory_space<smem>>) -> (i32, i32) {
    %c0_i32 = arith.constant 0 : i32
    %c0_i32_0 = arith.constant 0 : i32
    %c0_i32_1 = arith.constant 0 : i32
    return %c0_i32, %c0_i32_0 : i32, i32
  }
  func.func @transform_5(%arg0: i32, %arg1: memref<2xi32, #tpu.memory_space<smem>>) -> (i32, i32) {
    %c0_i32 = arith.constant 0 : i32
    %c0_i32_0 = arith.constant 0 : i32
    %c0_i32_1 = arith.constant 0 : i32
    return %c0_i32, %c0_i32_0 : i32, i32
  }
  func.func @transform_6(%arg0: i32, %arg1: memref<2xi32, #tpu.memory_space<smem>>) -> (i32, i32) {
    %c0_i32 = arith.constant 0 : i32
    %c0_i32_0 = arith.constant 0 : i32
    %c0_i32_1 = arith.constant 0 : i32
    return %c0_i32, %c0_i32_0 : i32, i32
  }
  func.func @transform_7(%arg0: i32, %arg1: memref<2xi32, #tpu.memory_space<smem>>) -> (i32, i32) {
    %c0_i32 = arith.constant 0 : i32
    %c0_i32_0 = arith.constant 0 : i32
    %c0_i32_1 = arith.constant 0 : i32
    return %c0_i32, %c0_i32_0 : i32, i32
  }
  func.func @transform_8(%arg0: i32, %arg1: memref<2xi32, #tpu.memory_space<smem>>) -> (i32, i32) {
    %c0_i32 = arith.constant 0 : i32
    %c0_i32_0 = arith.constant 0 : i32
    %c0_i32_1 = arith.constant 0 : i32
    return %c0_i32, %c0_i32_0 : i32, i32
  }
  func.func @transform_9(%arg0: i32, %arg1: memref<2xi32, #tpu.memory_space<smem>>) -> (i32, i32) {
    %c0_i32 = arith.constant 0 : i32
    %c0_i32_0 = arith.constant 0 : i32
    %c0_i32_1 = arith.constant 0 : i32
    return %c0_i32, %c0_i32_0 : i32, i32
  }
  func.func @transform_10(%arg0: i32, %arg1: memref<2xi32, #tpu.memory_space<smem>>) -> (i32, i32) {
    %c0_i32 = arith.constant 0 : i32
    %c0_i32_0 = arith.constant 0 : i32
    %c0_i32_1 = arith.constant 0 : i32
    return %c0_i32, %c0_i32_0 : i32, i32
  }
  func.func @transform_11(%arg0: i32, %arg1: memref<2xi32, #tpu.memory_space<smem>>) -> (i32, i32) {
    %c0_i32 = arith.constant 0 : i32
    %c0_i32_0 = arith.constant 0 : i32
    %c0_i32_1 = arith.constant 0 : i32
    return %c0_i32, %c0_i32_0 : i32, i32
  }
  func.func @transform_12(%arg0: i32, %arg1: memref<2xi32, #tpu.memory_space<smem>>) -> (i32, i32, i32) {
    %c0_i32 = arith.constant 0 : i32
    %c0_i32_0 = arith.constant 0 : i32
    %c0_i32_1 = arith.constant 0 : i32
    return %arg0, %c0_i32, %c0_i32_0 : i32, i32, i32
  }
}

module attributes {stable_mosaic.version = 11 : i64} {
  func.func @attn_kernel(%arg0: i32, %arg1: memref<2xi32, #tpu.memory_space<smem>>, %arg2: memref<1x4x8x8xf32, #tpu.memory_space<vmem>>, %arg3: memref<1x4x8x8xf32, #tpu.memory_space<vmem>>, %arg4: memref<1x4x8x8xf32, #tpu.memory_space<vmem>>, %arg5: memref<1x4x8x8xf32, #tpu.memory_space<vmem>>) attributes {dimension_semantics = [#tpu.dimension_semantics<parallel>], iteration_bounds = array<i64: 2>, scalar_prefetch = 1 : i64, scratch_operands = 0 : i64, tpu.core_type = #tpu.core_type<tc>, window_params = [{transform_indices = @transform_0, window_bounds = array<i64: 1, 4, 8, 8>}, {transform_indices = @transform_1, window_bounds = array<i64: 1, 4, 8, 8>}, {transform_indices = @transform_2, window_bounds = array<i64: 1, 4, 8, 8>}, {transform_indices = @transform_3, window_bounds = array<i64: 1, 4, 8, 8>}]} {
    %c0 = arith.constant 0 : index
    %c0_0 = arith.constant 0 : index
    %c0_1 = arith.constant 0 : index
    %c0_2 = arith.constant 0 : index
    %0 = vector.load %arg2[%c0, %c0_0, %c0_1, %c0_2] : memref<1x4x8x8xf32, #tpu.memory_space<vmem>>, vector<1x4x8x8xf32>
    %1 = vector.shape_cast %0 : vector<1x4x8x8xf32> to vector<4x8x8xf32>
    %2 = arith.truncf %1 : vector<4x8x8xf32> to vector<4x8x8xbf16>
    %c0_3 = arith.constant 0 : index
    %c0_4 = arith.constant 0 : index
    %c0_5 = arith.constant 0 : index
    %c0_6 = arith.constant 0 : index
    %3 = vector.load %arg3[%c0_3, %c0_4, %c0_5, %c0_6] : memref<1x4x8x8xf32, #tpu.memory_space<vmem>>, vector<1x4x8x8xf32>
    %4 = vector.shape_cast %3 : vector<1x4x8x8xf32> to vector<4x8x8xf32>
    %5 = arith.truncf %4 : vector<4x8x8xf32> to vector<4x8x8xbf16>
    %c0_7 = arith.constant 0 : index
    %c0_8 = arith.constant 0 : index
    %c0_9 = arith.constant 0 : index
    %c0_10 = arith.constant 0 : index
    %6 = vector.load %arg4[%c0_7, %c0_8, %c0_9, %c0_10] : memref<1x4x8x8xf32, #tpu.memory_space<vmem>>, vector<1x4x8x8xf32>
    %7 = vector.shape_cast %6 : vector<1x4x8x8xf32> to vector<4x8x8xf32>
    %8 = arith.truncf %7 : vector<4x8x8xf32> to vector<4x8x8xbf16>
    "tpu.trace_start"() <{level = 10 : i32, message = "hqd,hkd->hqk"}> : () -> ()
    %cst = arith.constant dense<0.000000e+00> : vector<4x8x8xf32>
    %9 = tpu.matmul %2, %5, %cst {dimension_numbers = #tpu.dot_dimension_numbers<[2], [2], [1], [1], [0, 0, 0, 1, 1, 1], [0], [0]>} : vector<4x8x8xbf16>, vector<4x8x8xbf16>, vector<4x8x8xf32> -> vector<4x8x8xf32>
    "tpu.trace_stop"() : () -> ()
    %10 = tpu.iota {dimensions = array<i32: 2>} : vector<1x1x8xi32>
    %11 = arith.index_cast %arg0 : i32 to index
    %12 = memref.load %arg1[%11] : memref<2xi32, #tpu.memory_space<smem>>
    %13 = vector.broadcast %12 : i32 to vector<1x1x8xi32>
    %14 = arith.cmpi sge, %10, %13 : vector<1x1x8xi32>
    %cst_11 = arith.constant -1.000000e+30 : f32
    %15 = vector.shape_cast %14 : vector<1x1x8xi1> to vector<1x1x8xi1>
    %16 = vector.broadcast %15 : vector<1x1x8xi1> to vector<4x8x8xi1>
    %17 = vector.broadcast %cst_11 : f32 to vector<4x8x8xf32>
    %18 = arith.select %16, %17, %9 : vector<4x8x8xi1>, vector<4x8x8xf32>
    %cst_12 = arith.constant dense<0xFF800000> : vector<4x8xf32>
    %19 = vector.multi_reduction <maximumf>, %18, %cst_12 [2] : vector<4x8x8xf32> to vector<4x8xf32>
    %20 = vector.shape_cast %19 : vector<4x8xf32> to vector<4x8x1xf32>
    %21 = vector.broadcast %20 : vector<4x8x1xf32> to vector<4x8x8xf32>
    %22 = arith.subf %18, %21 : vector<4x8x8xf32>
    %23 = math.exp %22 : vector<4x8x8xf32>
    %cst_13 = arith.constant dense<0.000000e+00> : vector<4x8xf32>
    %24 = vector.multi_reduction <add>, %23, %cst_13 [2] : vector<4x8x8xf32> to vector<4x8xf32>
    %25 = vector.shape_cast %24 : vector<4x8xf32> to vector<4x8x1xf32>
    %26 = tpu.reciprocal %25 {approx = true} : vector<4x8x1xf32> -> vector<4x8x1xf32>
    %27 = vector.broadcast %26 : vector<4x8x1xf32> to vector<4x8x8xf32>
    %28 = arith.mulf %23, %27 : vector<4x8x8xf32>
    %29 = arith.truncf %28 : vector<4x8x8xf32> to vector<4x8x8xbf16>
    "tpu.trace_start"() <{level = 10 : i32, message = "hqk,hkd->hqd"}> : () -> ()
    %cst_14 = arith.constant dense<0.000000e+00> : vector<4x8x8xf32>
    %30 = tpu.matmul %29, %8, %cst_14 {dimension_numbers = #tpu.dot_dimension_numbers<[2], [1], [1], [2], [0, 0, 0, 1, 1, 2], [0], [0]>} : vector<4x8x8xbf16>, vector<4x8x8xbf16>, vector<4x8x8xf32> -> vector<4x8x8xf32>
    "tpu.trace_stop"() : () -> ()
    %c0_15 = arith.constant 0 : index
    %c0_16 = arith.constant 0 : index
    %c0_17 = arith.constant 0 : index
    %c0_18 = arith.constant 0 : index
    %31 = vector.load %arg5[%c0_15, %c0_16, %c0_17, %c0_18] : memref<1x4x8x8xf32, #tpu.memory_space<vmem>>, vector<1x4x8x8xf32>
    %32 = vector.shape_cast %31 : vector<1x4x8x8xf32> to vector<4x8x8xf32>
    %33 = vector.shape_cast %30 : vector<4x8x8xf32> to vector<1x4x8x8xf32>
    tpu.vector_store %arg5[%c0_15, %c0_16, %c0_17, %c0_18], %33 {strides = array<i32>} : memref<1x4x8x8xf32, #tpu.memory_space<vmem>>, vector<1x4x8x8xf32>,
    return
  }
  func.func @transform_0(%arg0: i32, %arg1: memref<2xi32, #tpu.memory_space<smem>>) -> (i32, i32, i32, i32) {
    %c0_i32 = arith.constant 0 : i32
    %c0_i32_0 = arith.constant 0 : i32
    %c0_i32_1 = arith.constant 0 : i32
    %c0_i32_2 = arith.constant 0 : i32
    return %arg0, %c0_i32, %c0_i32_0, %c0_i32_1 : i32, i32, i32, i32
  }
  func.func @transform_1(%arg0: i32, %arg1: memref<2xi32, #tpu.memory_space<smem>>) -> (i32, i32, i32, i32) {
    %c0_i32 = arith.constant 0 : i32
    %c0_i32_0 = arith.constant 0 : i32
    %c0_i32_1 = arith.constant 0 : i32
    %c0_i32_2 = arith.constant 0 : i32
    return %arg0, %c0_i32, %c0_i32_0, %c0_i32_1 : i32, i32, i32, i32
  }
  func.func @transform_2(%arg0: i32, %arg1: memref<2xi32, #tpu.memory_space<smem>>) -> (i32, i32, i32, i32) {
    %c0_i32 = arith.constant 0 : i32
    %c0_i32_0 = arith.constant 0 : i32
    %c0_i32_1 = arith.constant 0 : i32
    %c0_i32_2 = arith.constant 0 : i32
    return %arg0, %c0_i32, %c0_i32_0, %c0_i32_1 : i32, i32, i32, i32
  }
  func.func @transform_3(%arg0: i32, %arg1: memref<2xi32, #tpu.memory_space<smem>>) -> (i32, i32, i32, i32) {
    %c0_i32 = arith.constant 0 : i32
    %c0_i32_0 = arith.constant 0 : i32
    %c0_i32_1 = arith.constant 0 : i32
    %c0_i32_2 = arith.constant 0 : i32
    return %arg0, %c0_i32, %c0_i32_0, %c0_i32_1 : i32, i32, i32, i32
  }
}

module attributes {stable_mosaic.version = 11 : i64} {
  func.func @post_kernel(%arg0: i32, %arg1: memref<2xi32, #tpu.memory_space<smem>>, %arg2: memref<1x8x32xf32, #tpu.memory_space<vmem>>, %arg3: memref<1x8x32xf32, #tpu.memory_space<vmem>>, %arg4: memref<32x32xbf16, #tpu.memory_space<vmem>>, %arg5: memref<1x32xf32, #tpu.memory_space<vmem>>, %arg6: memref<1x32xf32, #tpu.memory_space<vmem>>, %arg7: memref<1x32xf32, #tpu.memory_space<vmem>>, %arg8: memref<32x64xbf16, #tpu.memory_space<vmem>>, %arg9: memref<1x64xf32, #tpu.memory_space<vmem>>, %arg10: memref<64x32xbf16, #tpu.memory_space<vmem>>, %arg11: memref<1x32xf32, #tpu.memory_space<vmem>>, %arg12: memref<1x32xf32, #tpu.memory_space<vmem>>, %arg13: memref<1x32xf32, #tpu.memory_space<vmem>>, %arg14: memref<1x8x32xf32, #tpu.memory_space<vmem>>) attributes {dimension_semantics = [#tpu.dimension_semantics<parallel>], iteration_bounds = array<i64: 2>, scalar_prefetch = 1 : i64, scratch_operands = 0 : i64, tpu.core_type = #tpu.core_type<tc>, window_params = [{transform_indices = @transform_0, window_bounds = array<i64: 1, 8, 32>}, {transform_indices = @transform_1, window_bounds = array<i64: 1, 8, 32>}, {pipeline_mode = #tpu.pipeline_mode<synchronous>, transform_indices = @transform_2, window_bounds = array<i64: 32, 32>}, {pipeline_mode = #tpu.pipeline_mode<synchronous>, transform_indices = @transform_3, window_bounds = array<i64: 1, 32>}, {pipeline_mode = #tpu.pipeline_mode<synchronous>, transform_indices = @transform_4, window_bounds = array<i64: 1, 32>}, {pipeline_mode = #tpu.pipeline_mode<synchronous>, transform_indices = @transform_5, window_bounds = array<i64: 1, 32>}, {pipeline_mode = #tpu.pipeline_mode<synchronous>, transform_indices = @transform_6, window_bounds = array<i64: 32, 64>}, {pipeline_mode = #tpu.pipeline_mode<synchronous>, transform_indices = @transform_7, window_bounds = array<i64: 1, 64>}, {pipeline_mode = #tpu.pipeline_mode<synchronous>, transform_indices = @transform_8, window_bounds = array<i64: 64, 32>}, {pipeline_mode = #tpu.pipeline_mode<synchronous>, transform_indices = @transform_9, window_bounds = array<i64: 1, 32>}, {pipeline_mode = #tpu.pipeline_mode<synchronous>, transform_indices = @transform_10, window_bounds = array<i64: 1, 32>}, {pipeline_mode = #tpu.pipeline_mode<synchronous>, transform_indices = @transform_11, window_bounds = array<i64: 1, 32>}, {transform_indices = @transform_12, window_bounds = array<i64: 1, 8, 32>}]} {
    %c0 = arith.constant 0 : index
    %c0_0 = arith.constant 0 : index
    %c0_1 = arith.constant 0 : index
    %0 = vector.load %arg3[%c0, %c0_0, %c0_1] : memref<1x8x32xf32, #tpu.memory_space<vmem>>, vector<1x8x32xf32>
    %1 = vector.shape_cast %0 : vector<1x8x32xf32> to vector<8x32xf32>
    %c0_2 = arith.constant 0 : index
    %c0_3 = arith.constant 0 : index
    %c0_4 = arith.constant 0 : index
    %2 = vector.load %arg2[%c0_2, %c0_3, %c0_4] : memref<1x8x32xf32, #tpu.memory_space<vmem>>, vector<1x8x32xf32>
    %3 = vector.shape_cast %2 : vector<1x8x32xf32> to vector<8x32xf32>
    %4 = arith.truncf %3 : vector<8x32xf32> to vector<8x32xbf16>
    %5 = tpu.iota {dimensions = array<i32: 0>} : vector<8x1xi32>
    %6 = arith.index_cast %arg0 : i32 to index
    %7 = memref.load %arg1[%6] : memref<2xi32, #tpu.memory_space<smem>>
    %8 = vector.broadcast %7 : i32 to vector<8x1xi32>
    %9 = arith.cmpi slt, %5, %8 : vector<8x1xi32>
    %10 = arith.extui %9 : vector<8x1xi1> to vector<8x1xi32>
    %11 = arith.sitofp %10 : vector<8x1xi32> to vector<8x1xf32>
    %c0_5 = arith.constant 0 : index
    %c0_6 = arith.constant 0 : index
    %12 = vector.load %arg4[%c0_5, %c0_6] : memref<32x32xbf16, #tpu.memory_space<vmem>>, vector<32x32xbf16>
    %cst = arith.constant dense<0.000000e+00> : vector<8x32xf32>
    %13 = tpu.matmul %4, %12, %cst {dimension_numbers = #tpu.dot_dimension_numbers<[1], [0], [0], [1], [0, 0, 1, 1], [], []>} : vector<8x32xbf16>, vector<32x32xbf16>, vector<8x32xf32> -> vector<8x32xf32>
    %c0_7 = arith.constant 0 : index
    %c0_8 = arith.constant 0 : index
    %14 = vector.load %arg5[%c0_7, %c0_8] : memref<1x32xf32, #tpu.memory_space<vmem>>, vector<1x32xf32>
    %15 = vector.broadcast %14 : vector<1x32xf32> to vector<8x32xf32>
    %16 = arith.addf %13, %15 : vector<8x32xf32>
    %17 = vector.broadcast %11 : vector<8x1xf32> to vector<8x32xf32>
    %18 = arith.mulf %16, %17 : vector<8x32xf32>
    %19 = arith.addf %18, %1 : vector<8x32xf32>
    %c0_9 = arith.constant 0 : index
    %c0_10 = arith.constant 0 : index
    %20 = vector.load %arg6[%c0_9, %c0_10] : memref<1x32xf32, #tpu.memory_space<vmem>>, vector<1x32xf32>
    %c0_11 = arith.constant 0 : index
    %c0_12 = arith.constant 0 : index
    %21 = vector.load %arg7[%c0_11, %c0_12] : memref<1x32xf32, #tpu.memory_space<vmem>>, vector<1x32xf32>
    %cst_13 = arith.constant dense<0.000000e+00> : vector<8xf32>
    %22 = vector.multi_reduction <add>, %19, %cst_13 [1] : vector<8x32xf32> to vector<8xf32>
    %23 = vector.shape_cast %22 : vector<8xf32> to vector<8x1xf32>
    %cst_14 = arith.constant 3.200000e+01 : f32
    %24 = vector.broadcast %cst_14 : f32 to vector<8x1xf32>
    %25 = arith.divf %23, %24 : vector<8x1xf32>
    %26 = vector.broadcast %25 : vector<8x1xf32> to vector<8x32xf32>
    %27 = arith.subf %19, %26 : vector<8x32xf32>
    %28 = arith.mulf %27, %27 : vector<8x32xf32>
    %cst_15 = arith.constant dense<0.000000e+00> : vector<8xf32>
    %29 = vector.multi_reduction <add>, %28, %cst_15 [1] : vector<8x32xf32> to vector<8xf32>
    %30 = vector.shape_cast %29 : vector<8xf32> to vector<8x1xf32>
    %cst_16 = arith.constant 3.200000e+01 : f32
    %31 = vector.broadcast %cst_16 : f32 to vector<8x1xf32>
    %32 = arith.divf %30, %31 : vector<8x1xf32>
    %33 = vector.broadcast %25 : vector<8x1xf32> to vector<8x32xf32>
    %34 = arith.subf %19, %33 : vector<8x32xf32>
    %cst_17 = arith.constant 9.99999974E-6 : f32
    %35 = vector.broadcast %cst_17 : f32 to vector<8x1xf32>
    %36 = arith.addf %32, %35 : vector<8x1xf32>
    %37 = math.rsqrt %36 : vector<8x1xf32>
    %38 = vector.broadcast %37 : vector<8x1xf32> to vector<8x32xf32>
    %39 = arith.mulf %34, %38 : vector<8x32xf32>
    %40 = vector.broadcast %20 : vector<1x32xf32> to vector<8x32xf32>
    %41 = arith.mulf %39, %40 : vector<8x32xf32>
    %42 = vector.broadcast %21 : vector<1x32xf32> to vector<8x32xf32>
    %43 = arith.addf %41, %42 : vector<8x32xf32>
    %44 = arith.truncf %43 : vector<8x32xf32> to vector<8x32xbf16>
    %c0_18 = arith.constant 0 : index
    %c0_19 = arith.constant 0 : index
    %45 = vector.load %arg8[%c0_18, %c0_19] : memref<32x64xbf16, #tpu.memory_space<vmem>>, vector<32x64xbf16>
    %cst_20 = arith.constant dense<0.000000e+00> : vector<8x64xf32>
    %46 = tpu.matmul %44, %45, %cst_20 {dimension_numbers = #tpu.dot_dimension_numbers<[1], [0], [0], [1], [0, 0, 1, 1], [], []>} : vector<8x32xbf16>, vector<32x64xbf16>, vector<8x64xf32> -> vector<8x64xf32>
    %c0_21 = arith.constant 0 : index
    %c0_22 = arith.constant 0 : index
    %47 = vector.load %arg9[%c0_21, %c0_22] : memref<1x64xf32, #tpu.memory_space<vmem>>, vector<1x64xf32>
    %48 = vector.broadcast %47 : vector<1x64xf32> to vector<8x64xf32>
    %49 = arith.addf %46, %48 : vector<8x64xf32>
    %cst_23 = arith.constant 0.000000e+00 : f32
    %50 = vector.broadcast %cst_23 : f32 to vector<8x64xf32>
    %51 = arith.maximumf %49, %50 : vector<8x64xf32>
    %52 = arith.truncf %51 : vector<8x64xf32> to vector<8x64xbf16>
    %c0_24 = arith.constant 0 : index
    %c0_25 = arith.constant 0 : index
    %53 = vector.load %arg10[%c0_24, %c0_25] : memref<64x32xbf16, #tpu.memory_space<vmem>>, vector<64x32xbf16>
    %cst_26 = arith.constant dense<0.000000e+00> : vector<8x32xf32>
    %54 = tpu.matmul %52, %53, %cst_26 {dimension_numbers = #tpu.dot_dimension_numbers<[1], [0], [0], [1], [0, 0, 1, 1], [], []>} : vector<8x64xbf16>, vector<64x32xbf16>, vector<8x32xf32> -> vector<8x32xf32>
    %c0_27 = arith.constant 0 : index
    %c0_28 = arith.constant 0 : index
    %55 = vector.load %arg11[%c0_27, %c0_28] : memref<1x32xf32, #tpu.memory_space<vmem>>, vector<1x32xf32>
    %56 = vector.broadcast %55 : vector<1x32xf32> to vector<8x32xf32>
    %57 = arith.addf %54, %56 : vector<8x32xf32>
    %58 = vector.broadcast %11 : vector<8x1xf32> to vector<8x32xf32>
    %59 = arith.mulf %57, %58 : vector<8x32xf32>
    %60 = arith.addf %59, %19 : vector<8x32xf32>
    %c0_29 = arith.constant 0 : index
    %c0_30 = arith.constant 0 : index
    %61 = vector.load %arg12[%c0_29, %c0_30] : memref<1x32xf32, #tpu.memory_space<vmem>>, vector<1x32xf32>
    %c0_31 = arith.constant 0 : index
    %c0_32 = arith.constant 0 : index
    %62 = vector.load %arg13[%c0_31, %c0_32] : memref<1x32xf32, #tpu.memory_space<vmem>>, vector<1x32xf32>
    %cst_33 = arith.constant dense<0.000000e+00> : vector<8xf32>
    %63 = vector.multi_reduction <add>, %60, %cst_33 [1] : vector<8x32xf32> to vector<8xf32>
    %64 = vector.shape_cast %63 : vector<8xf32> to vector<8x1xf32>
    %cst_34 = arith.constant 3.200000e+01 : f32
    %65 = vector.broadcast %cst_34 : f32 to vector<8x1xf32>
    %66 = arith.divf %64, %65 : vector<8x1xf32>
    %67 = vector.broadcast %66 : vector<8x1xf32> to vector<8x32xf32>
    %68 = arith.subf %60, %67 : vector<8x32xf32>
    %69 = arith.mulf %68, %68 : vector<8x32xf32>
    %cst_35 = arith.constant dense<0.000000e+00> : vector<8xf32>
    %70 = vector.multi_reduction <add>, %69, %cst_35 [1] : vector<8x32xf32> to vector<8xf32>
    %71 = vector.shape_cast %70 : vector<8xf32> to vector<8x1xf32>
    %cst_36 = arith.constant 3.200000e+01 : f32
    %72 = vector.broadcast %cst_36 : f32 to vector<8x1xf32>
    %73 = arith.divf %71, %72 : vector<8x1xf32>
    %74 = vector.broadcast %66 : vector<8x1xf32> to vector<8x32xf32>
    %75 = arith.subf %60, %74 : vector<8x32xf32>
    %cst_37 = arith.constant 9.99999974E-6 : f32
    %76 = vector.broadcast %cst_37 : f32 to vector<8x1xf32>
    %77 = arith.addf %73, %76 : vector<8x1xf32>
    %78 = math.rsqrt %77 : vector<8x1xf32>
    %79 = vector.broadcast %78 : vector<8x1xf32> to vector<8x32xf32>
    %80 = arith.mulf %75, %79 : vector<8x32xf32>
    %81 = vector.broadcast %61 : vector<1x32xf32> to vector<8x32xf32>
    %82 = arith.mulf %80, %81 : vector<8x32xf32>
    %83 = vector.broadcast %62 : vector<1x32xf32> to vector<8x32xf32>
    %84 = arith.addf %82, %83 : vector<8x32xf32>
    %c0_38 = arith.constant 0 : index
    %c0_39 = arith.constant 0 : index
    %c0_40 = arith.constant 0 : index
    %85 = vector.load %arg14[%c0_38, %c0_39, %c0_40] : memref<1x8x32xf32, #tpu.memory_space<vmem>>, vector<1x8x32xf32>
    %86 = vector.shape_cast %85 : vector<1x8x32xf32> to vector<8x32xf32>
    %87 = vector.shape_cast %84 : vector<8x32xf32> to vector<1x8x32xf32>
    tpu.vector_store %arg14[%c0_38, %c0_39, %c0_40], %87 {strides = array<i32>} : memref<1x8x32xf32, #tpu.memory_space<vmem>>, vector<1x8x32xf32>,
    return
  }
  func.func @transform_0(%arg0: i32, %arg1: memref<2xi32, #tpu.memory_space<smem>>) -> (i32, i32, i32) {
    %c0_i32 = arith.constant 0 : i32
    %c0_i32_0 = arith.constant 0 : i32
    %c0_i32_1 = arith.constant 0 : i32
    return %arg0, %c0_i32, %c0_i32_0 : i32, i32, i32
  }
  func.func @transform_1(%arg0: i32, %arg1: memref<2xi32, #tpu.memory_space<smem>>) -> (i32, i32, i32) {
    %c0_i32 = arith.constant 0 : i32
    %c0_i32_0 = arith.constant 0 : i32
    %c0_i32_1 = arith.constant 0 : i32
    return %arg0, %c0_i32, %c0_i32_0 : i32, i32, i32
  }
  func.func @transform_2(%arg0: i32, %arg1: memref<2xi32, #tpu.memory_space<smem>>) -> (i32, i32) {
    %c0_i32 = arith.constant 0 : i32
    %c0_i32_0 = arith.constant 0 : i32
    %c0_i32_1 = arith.constant 0 : i32
    return %c0_i32, %c0_i32_0 : i32, i32
  }
  func.func @transform_3(%arg0: i32, %arg1: memref<2xi32, #tpu.memory_space<smem>>) -> (i32, i32) {
    %c0_i32 = arith.constant 0 : i32
    %c0_i32_0 = arith.constant 0 : i32
    %c0_i32_1 = arith.constant 0 : i32
    return %c0_i32, %c0_i32_0 : i32, i32
  }
  func.func @transform_4(%arg0: i32, %arg1: memref<2xi32, #tpu.memory_space<smem>>) -> (i32, i32) {
    %c0_i32 = arith.constant 0 : i32
    %c0_i32_0 = arith.constant 0 : i32
    %c0_i32_1 = arith.constant 0 : i32
    return %c0_i32, %c0_i32_0 : i32, i32
  }
  func.func @transform_5(%arg0: i32, %arg1: memref<2xi32, #tpu.memory_space<smem>>) -> (i32, i32) {
    %c0_i32 = arith.constant 0 : i32
    %c0_i32_0 = arith.constant 0 : i32
    %c0_i32_1 = arith.constant 0 : i32
    return %c0_i32, %c0_i32_0 : i32, i32
  }
  func.func @transform_6(%arg0: i32, %arg1: memref<2xi32, #tpu.memory_space<smem>>) -> (i32, i32) {
    %c0_i32 = arith.constant 0 : i32
    %c0_i32_0 = arith.constant 0 : i32
    %c0_i32_1 = arith.constant 0 : i32
    return %c0_i32, %c0_i32_0 : i32, i32
  }
  func.func @transform_7(%arg0: i32, %arg1: memref<2xi32, #tpu.memory_space<smem>>) -> (i32, i32) {
    %c0_i32 = arith.constant 0 : i32
    %c0_i32_0 = arith.constant 0 : i32
    %c0_i32_1 = arith.constant 0 : i32
    return %c0_i32, %c0_i32_0 : i32, i32
  }
  func.func @transform_8(%arg0: i32, %arg1: memref<2xi32, #tpu.memory_space<smem>>) -> (i32, i32) {
    %c0_i32 = arith.constant 0 : i32
    %c0_i32_0 = arith.constant 0 : i32
    %c0_i32_1 = arith.constant 0 : i32
    return %c0_i32, %c0_i32_0 : i32, i32
  }
  func.func @transform_9(%arg0: i32, %arg1: memref<2xi32, #tpu.memory_space<smem>>) -> (i32, i32) {
    %c0_i32 = arith.constant 0 : i32
    %c0_i32_0 = arith.constant 0 : i32
    %c0_i32_1 = arith.constant 0 : i32
    return %c0_i32, %c0_i32_0 : i32, i32
  }
  func.func @transform_10(%arg0: i32, %arg1: memref<2xi32, #tpu.memory_space<smem>>) -> (i32, i32) {
    %c0_i32 = arith.constant 0 : i32
    %c0_i32_0 = arith.constant 0 : i32
    %c0_i32_1 = arith.constant 0 : i32
    return %c0_i32, %c0_i32_0 : i32, i32
  }
  func.func @transform_11(%arg0: i32, %arg1: memref<2xi32, #tpu.memory_space<smem>>) -> (i32, i32) {
    %c0_i32 = arith.constant 0 : i32
    %c0_i32_0 = arith.constant 0 : i32
    %c0_i32_1 = arith.constant 0 : i32
    return %c0_i32, %c0_i32_0 : i32, i32
  }
  func.func @transform_12(%arg0: i32, %arg1: memref<2xi32, #tpu.memory_space<smem>>) -> (i32, i32, i32) {
    %c0_i32 = arith.constant 0 : i32
    %c0_i32_0 = arith.constant 0 : i32
    %c0_i32_1 = arith.constant 0 : i32
    return %arg0, %c0_i32, %c0_i32_0 : i32, i32, i32
  }
}

</mosaic_0001>

<bundles_post_ra>
// kernel: encoder_blocks_forward.7
= control target key start
LH: loop header
LB: loop body
LE: loop exit
PB: predicated region body
PF: predicated region fallthrough
CT: control target
= control target key end

     0   :  { %s257_s15 = smov [#allocation3]   ;;  %s296_s0 = inlined_call_operand.vmem [shape: s32[2], index: 0, kind: input, shape index: {}]   ;;  %s297_s1 = inlined_call_operand.vmem [shape: f32[2,8,32], index: 1, kind: input, shape index: {}]   ;;  %s298_s2 = inlined_call_operand.vmem [shape: f32[8,32], index: 2, kind: input, shape index: {}]   ;;  %s299_s3 = inlined_call_operand.vmem [shape: f32[2,8,32], index: 3, kind: output, shape index: {}]  }
   0x1   :  { %s9_s14 = sshll.u32 %s296_s0, 4  ;;  %s10_s14 = int_to_ptr.vmem [resolvable:$true] %s9_s14 }
   0x2   :  { %12 = dma.vmem_to_smem %s10_s14, 16, %s257_s15, [#allocation2] }
   0x3   :  { %251 = dma.done.wait [#allocation2], 16 }
   0x4   :  { %252 = vsyncadd [#allocation2], 4294967280 }
   0x5   :  { %15 = sfence }
   0x6   :  { %s282_s16 = smov 0  }
   0x7 LB: > { %s215_s17 = sadd.s32 4294967295, %s255_s16   ;;  %p219_p0 = scmp.ge.s32.totalorder %s255_s16, 1  ;;  %s255_s16 = sphi %s282_s16, %s21_s16  }
   0x8   : > { %p120_p1 = scmp.lt.s32.totalorder %s255_s16, 3 }
   0xa   : > { %p121_p2 = pnand %p219_p0, %p120_p1 }
   0xb   : > { %p140_p3 = scmp.lt.s32.totalorder (!%p121_p2), %s215_s17, 1  ;;  %s150_s0 = sld [smem:[#allocation3 + %s215_s17]] (!%p121_p2) }
   0xc   : > { %124 = sbr.rel (%p121_p2) target bundleno = 28 (0x1c), region = 28 }
  0x11   : > { %v148_v0 = vlaneseq  ;;  %s301_s17 = smov (!%p140_p3, %s215_s17), 1  ;;  %v151_v2 = vstv %s150_s0  ;;  %v157_v4 = vld [vmem:[%s298_s2] sm:$0xff]  ;;  %v258_v6 = vmov 0.0   ;;  %vm160_vm1 = vcmask 261120  }
  0x12   : > { %s220_s18 = sshll.u32 %s301_s17, 3 }
  0x13   : > { %v149_v1 = vshrl.u32 %v148_v0, 7  ;;  %s143_s21 = scalar_lea.vmem %s297_s1, %s220_s18  ;;  %s147_s26 = scalar_lea.vmem %s299_s3, %s220_s18 }
  0x14   : > { %v155_v3 = vld [vmem:[%s143_s21] sm:$0xff] }
  0x15   : > { %vm152_vm0 = vcmp.lt.s32.totalorder %v149_v1, %v151_v2  ;;  %v156_v5 = vmul.f32 5.656854, %v155_v3 }
  0x16   : > { %v222_v7 = vsel %vm152_vm0, 1.0, %v258_v6 }
  0x17   : > { %v158_v8 = vadd.f32 %v157_v4, %v156_v5 }
  0x19   : > { %v159_v9 = vmul.f32 %v222_v7, %v158_v8 }
  0x1b   : > { %161 = vst.msk [vmem:[%s147_s26] sm:$0xff] %vm160_vm1, %v159_v9 }
  0x1c PF: > { %s21_s16 = sadd.s32 1, %s255_s16  }
  0x1d   : > { %p18_p4 = scmp.ge.s32.totalorder %s21_s16, 4  }
  0x1f   :  { %20 = sbr.rel (!%p18_p4) target bundleno = 7 (0x7), region = 58 }

// kernel: encoder_blocks_forward.8
= control target key start
LH: loop header
LB: loop body
LE: loop exit
PB: predicated region body
PF: predicated region fallthrough
CT: control target
= control target key end

     0   :  { %s575_s21 = smov 0   ;;  %s616_s0 = inlined_call_operand.vmem [shape: f32[2,8,32], index: 0, kind: input, shape index: {}]   ;;  %s617_s1 = inlined_call_operand.vmem [shape: bf16[32,32], index: 1, kind: input, shape index: {}]   ;;  %s618_s2 = inlined_call_operand.vmem [shape: bf16[32,32], index: 2, kind: input, shape index: {}]   ;;  %s619_s3 = inlined_call_operand.vmem [shape: bf16[32,32], index: 3, kind: input, shape index: {}]   ;;  %s620_s4 = inlined_call_operand.vmem [shape: f32[2,8,32], index: 4, kind: output, shape index: {0}]   ;;  %s621_s5 = inlined_call_operand.vmem [shape: f32[2,8,32], index: 5, kind: output, shape index: {1}]   ;;  %s622_s6 = inlined_call_operand.vmem [shape: f32[2,8,32], index: 6, kind: output, shape index: {2}]  }
   0x1 LB: > { %s480_s22 = sadd.s32 4294967295, %s538_s21   ;;  %p484_p0 = scmp.ge.s32.totalorder %s538_s21, 1  ;;  %s538_s21 = sphi %s575_s21, %s17_s21  }
   0x2   : > { %p216_p1 = scmp.lt.s32.totalorder %s538_s21, 3 }
   0x4   : > { %p217_p2 = pnand %p484_p0, %p216_p1 }
   0x5   : > { %p252_p3 = scmp.lt.s32.totalorder (!%p217_p2), %s480_s22, 1 }
   0x6   : > { %220 = sbr.rel (%p217_p2) target bundleno = 161 (0xa1), region = 36 }
   0xb   : > { %v519_v0 = vld [vmem:[%s617_s1 + $0x8] sm:$0xff]  ;;  %v518_v3 = vld [vmem:[%s617_s1] sm:$0xff]  ;;  %s624_s22 = smov (!%p252_p3, %s480_s22), 1  ;;  %vm287_vm0 = vcmask 261120  }
   0xc   : > { %v521_v1 = vld [vmem:[%s618_s2 + $0x8] sm:$0xff]  ;;  %297 = vmatpush.bf16.msra.mxu0 %v519_v0  ;;  %v520_v4 = vld [vmem:[%s618_s2] sm:$0xff]  ;;  %s485_s11 = sshll.u32 %s624_s22, 3 }
   0xd   : > { %v523_v2 = vld [vmem:[%s619_s3 + $0x8] sm:$0xff]  ;;  %327 = vmatpush.bf16.msra.mxu1 %v521_v1  ;;  %v522_v5 = vld [vmem:[%s619_s3] sm:$0xff]  ;;  %s255_s14 = scalar_lea.vmem %s616_s0, %s485_s11  ;;  %s259_s17 = scalar_lea.vmem %s620_s4, %s485_s11 }
   0xe   : > { %357 = vmatpush.bf16.msra.mxu2 %v523_v2  ;;  %v269_v6 = vld [vmem:[%s255_s14] sm:$0xff]  ;;  %s263_s20 = scalar_lea.vmem %s621_s5, %s485_s11  ;;  %s267_s24 = scalar_lea.vmem %s622_s6, %s485_s11 }
   0xf   : > { %v270_v7 = vpack.c.bf16 %v269_v6, %v269_v6 }
  0x10   : > { %298 = vmatpush.bf16.msra.mxu0 %v518_v3 }
  0x11   : > { %328 = vmatpush.bf16.msra.mxu1 %v520_v4 }
  0x12   : > { %358 = vmatpush.bf16.msra.mxu2 %v522_v5 }
  0x13   : > { %497 = vmatmul.msk.bf16.vlgmr.msra.gmra.mxu0 %vm287_vm0, %v270_v7 }
  0x14   : > { %506 = vmatmul.msk.bf16.vlgmr.msra.gmra.mxu1 %vm287_vm0, %v270_v7 }
  0x15   : > { %515 = vmatmul.msk.bf16.vlgmr.msra.gmra.mxu2 %vm287_vm0, %v270_v7 }
  0x90   : > { %v300_v8 = vpop.f32.mrf.mxu0 }
  0x91   : > { %v330_v9 = vpop.f32.mrf.mxu1  ;;  %304 = vst.msk [vmem:[%s259_s17] sm:$0xff] %vm287_vm0, %v300_v8 }
  0x92   : > { %334 = vst.msk [vmem:[%s263_s20] sm:$0xff] %vm287_vm0, %v330_v9 }
  0x98   : > { %v360_v10 = vpop.f32.mrf.mxu2  ;;  %v302_v11 = vpop.f32.mrf.mxu0 }
  0x99   : > { %364 = vst.msk [vmem:[%s267_s24] sm:$0xff] %vm287_vm0, %v360_v10  ;;  %v332_v12 = vpop.f32.mrf.mxu1 }
  0xa0   : > { %v362_v13 = vpop.f32.mrf.mxu2 }
  0xa1 PF: > { %s17_s21 = sadd.s32 1, %s538_s21  }
  0xa2   : > { %p14_p4 = scmp.ge.s32.totalorder %s17_s21, 4  }
  0xa4   :  { %16 = sbr.rel (!%p14_p4) target bundleno = 1 (0x1), region = 90 }

// kernel: encoder_blocks_forward.10
= control target key start
LH: loop header
LB: loop body
LE: loop exit
PB: predicated region body
PF: predicated region fallthrough
CT: control target
= control target key end

     0   :  { %s816_s28 = smov [#allocation3]   ;;  %s984_s0 = inlined_call_operand.vmem [shape: s32[2], index: 0, kind: input, shape index: {}]   ;;  %s985_s1 = inlined_call_operand.vmem [shape: f32[2,8,32], index: 1, kind: input, shape index: {}]   ;;  %s986_s2 = inlined_call_operand.vmem [shape: f32[2,8,32], index: 2, kind: input, shape index: {}]   ;;  %s987_s3 = inlined_call_operand.vmem [shape: bf16[32,32], index: 3, kind: input, shape index: {}]   ;;  %s988_s4 = inlined_call_operand.vmem [shape: f32[1,32], index: 4, kind: input, shape index: {}]   ;;  %s989_s5 = inlined_call_operand.vmem [shape: f32[1,32], index: 5, kind: input, shape index: {}]   ;;  %s990_s6 = inlined_call_operand.vmem [shape: f32[1,32], index: 6, kind: input, shape index: {}]   ;;  %s991_s7 = inlined_call_operand.vmem [shape: bf16[32,64], index: 7, kind: input, shape index: {}]   ;;  %s992_s8 = inlined_call_operand.vmem [shape: f32[1,64], index: 8, kind: input, shape index: {}]   ;;  %s993_s9 = inlined_call_operand.vmem [shape: bf16[64,32], index: 9, kind: input, shape index: {}]   ;;  %s994_s10 = inlined_call_operand.vmem [shape: f32[1,32], index: 10, kind: input, shape index: {}]   ;;  %s995_s11 = inlined_call_operand.vmem [shape: f32[1,32], index: 11, kind: input, shape index: {}]   ;;  %s996_s12 = inlined_call_operand.vmem [shape: f32[1,32], index: 12, kind: input, shape index: {}]   ;;  %s997_s13 = inlined_call_operand.vmem [shape: f32[2,8,32], index: 13, kind: output, shape index: {}]  }
   0x1   :  { %s19_s27 = sshll.u32 %s984_s0, 4  ;;  %s20_s27 = int_to_ptr.vmem [resolvable:$true] %s19_s27 }
   0x2   :  { %22 = dma.vmem_to_smem %s20_s27, 16, %s816_s28, [#allocation2] }
   0x3   :  { %810 = dma.done.wait [#allocation2], 16 }
   0x4   :  { %811 = vsyncadd [#allocation2], 4294967280 }
   0x5   :  { %25 = sfence }
   0x6   :  { %s892_s29 = smov 0  }
   0x7 LB: > { %s716_s30 = sadd.s32 4294967295, %s814_s29   ;;  %p720_p0 = scmp.ge.s32.totalorder %s814_s29, 1  ;;  %s814_s29 = sphi %s892_s29, %s31_s29  }
   0x8   : > { %p379_p1 = scmp.lt.s32.totalorder %s814_s29, 3 }
   0xa   : > { %p380_p2 = pnand %p720_p0, %p379_p1 }
   0xb   : > { %p423_p3 = scmp.lt.s32.totalorder (!%p380_p2), %s716_s30, 1  ;;  %s441_s22 = sld [smem:[#allocation3 + %s716_s30]] (!%p380_p2) }
   0xc   : > { %383 = sbr.rel (%p380_p2) target bundleno = 966 (0x3c6), region = 68 }
  0x11   : > { %v763_v0 = vld [vmem:[%s987_s3 + $0x8] sm:$0xff]  ;;  %v762_v1 = vld [vmem:[%s987_s3] sm:$0xff]  ;;  %s424_s17 = scalar_select %p423_p3, %s716_s30, 1  ;;  %vm466_vm0 = vcmask 261120   ;;  %v439_v4 = vlaneseq  ;;  %v442_v6 = vstv %s441_s22  ;;  %v817_v8 = vmov 0.0   ;;  %v769_v31 = vld [vmem:[%s993_s9 + $0x18] sm:$0xff] }
  0x12   : > { %476 = vmatpush.bf16.msra.mxu0 %v763_v0  ;;  %v781_v7 = vld [vmem:[%s988_s4] ss:$0 sm:$0xff]  ;;  %v818_v17 = vmov 32.0   ;;  %v765_v29 = vld [vmem:[%s991_s7 + $0x8] sm:$0xff]  ;;  %607 = vmatpush.bf16.msra.mxu2 %v769_v31  ;;  %v768_v34 = vld [vmem:[%s993_s9 + $0x10] sm:$0xff]  ;;  %vm599_vm6 = vcmask 523264  }
  0x13   : > { %s906_s18 = sshll.u32 %s424_s17, 3  ;;  %v440_v5 = vshrl.u32 %v439_v4, 7  ;;  %788 = vrcp.f32 %v818_v17  ;;  %554 = vmatpush.bf16.msra.mxu1 %v765_v29  ;;  %v764_v30 = vld [vmem:[%s991_s7] sm:$0xff]  ;;  %v767_v49 = vld [vmem:[%s993_s9 + $0x8] sm:$0xff] }
  0x14   : > { %s426_s21 = scalar_lea.vmem %s985_s1, %s906_s18  ;;  %s430_s27 = scalar_lea.vmem %s986_s2, %s906_s18  ;;  %v782_v42 = vld [vmem:[%s989_s5] ss:$0 sm:$0xff] }
  0x15   : > { %v437_v2 = vld [vmem:[%s426_s21] sm:$0xff]  ;;  %vm443_vm1 = vcmp.lt.s32.totalorder %v440_v5, %v442_v6  ;;  %s434_s22 = scalar_lea.vmem %s997_s13, %s906_s18 }
  0x16   : > { %477 = vmatpush.bf16.msra.mxu0 %v762_v1  ;;  %v438_v3 = vpack.c.bf16 %v437_v2, %v437_v2  ;;  %v920_v9 = vsel %vm443_vm1, 1.0, %v817_v8  ;;  %v436_v12 = vld [vmem:[%s430_s27] sm:$0xff]  ;;  %608 = vmatpush.bf16.msra.mxu2 %v768_v34 }
  0x17   : > { %555 = vmatpush.bf16.msra.mxu1 %v764_v30  ;;  %v783_v45 = vld [vmem:[%s990_s6] ss:$0 sm:$0xff] }
  0x18   : > { %v766_v50 = vld [vmem:[%s993_s9] sm:$0xff] }
  0x19   : > { %733 = vmatmul.msk.bf16.vlgmr.msra.gmra.mxu0 %vm466_vm0, %v438_v3  ;;  %v789_v18 = vpop.eup %788  ;;  %v784_v51 = vld [vmem:[%s992_s8] ss:$0 sm:$0xff] }
  0x1a   : > { %v491_v19 = vmul.f32 32.0, %v789_v18  ;;  %vm495_vm2 = vweird.f32 %v789_v18  ;;  %609 = vmatpush.bf16.msra.mxu2 %v767_v49  ;;  %v785_v57 = vld [vmem:[%s994_s10] ss:$0 sm:$0xff] }
  0x1c   : > { %v492_v20 = vsub.f32 1.0, %v491_v19 }
  0x1e   : > { %v493_v21 = vmul.f32 %v789_v18, %v492_v20  ;;  %610 = vmatpush.bf16.msra.mxu2 %v766_v50 }
  0x20   : > { %v494_v22 = vadd.f32 %v789_v18, %v493_v21 }
  0x22   : > { %v927_v23 = vsel %vm495_vm2, %v789_v18, %v494_v22 }
  0x96   : > { %v479_v10 = vpop.f32.mrf.mxu0 }
  0x97   : > { %v480_v11 = vadd.f32 %v781_v7, %v479_v10 }
  0x99   : > { %v483_v13 = vmul.f32 %v920_v9, %v480_v11 }
  0x9b   : > { %v923_v14 = vadd.f32 %v483_v13, %v436_v12 }
  0x9d   : > { %v487_v15 = vsel %vm466_vm0, %v923_v14, 0.0 }
  0x9e   : > { %v481_v16 = vpop.f32.mrf.mxu0  ;;  %488 = vadd.xlane.f32.xlu0 %v487_v15 }
  0x9f   : > { %v787_v16 = vld [vmem:[%s996_s12] ss:$0 sm:$0xff] }
 0x111   : > { %v489_v24 = vpop.xlane.xlu0 %488 }
 0x112   : > { %v497_v25 = vmul.f32 %v927_v23, %v489_v24 }
 0x114   : > { %v498_v26 = vsub.f32 %v923_v14, %v497_v25 }
 0x116   : > { %v499_v27 = vmul.f32 %v498_v26, %v498_v26 }
 0x118   : > { %v500_v28 = vsel %vm466_vm0, %v499_v27, 0.0 }
 0x119   : > { %501 = vadd.xlane.f32.xlu0 %v500_v28 }
 0x18c   : > { %v502_v32 = vpop.xlane.xlu0 %501 }
 0x18d   : > { %v503_v33 = vmul.f32 %v502_v32, %v927_v23 }
 0x18f   : > { %v504_v35 = vadd.f32 1e-05, %v503_v33 }
 0x191   : > { %790 = vrsqrt.f32 %v504_v35  ;;  %vm511_vm4 = vweird.f32 %v504_v35 }
 0x197   : > { %v791_v36 = vpop.eup %790 }
 0x198   : > { %v506_v37 = vmul.f32 %v791_v36, %v504_v35  ;;  %vm512_vm3 = vweird.f32 %v791_v36 }
 0x199   : > { %vm513_vm5 = vmor %vm511_vm4, %vm512_vm3 }
 0x19a   : > { %v507_v38 = vmul.f32 %v791_v36, %v506_v37 }
 0x19c   : > { %v508_v39 = vmul.f32 0.5, %v507_v38 }
 0x19e   : > { %v509_v40 = vsub.f32 1.5, %v508_v39 }
 0x1a0   : > { %v510_v41 = vmul.f32 %v791_v36, %v509_v40 }
 0x1a2   : > { %v514_v43 = vsel %vm513_vm5, %v791_v36, %v510_v41 }
 0x1a3   : > { %v515_v44 = vmul.f32 %v514_v43, %v498_v26 }
 0x1a5   : > { %v519_v46 = vmul.f32 %v782_v42, %v515_v44 }
 0x1a7   : > { %v523_v47 = vadd.f32 %v783_v45, %v519_v46 }
 0x1a9   : > { %v524_v48 = vpack.c.bf16 %v523_v47, %v523_v47 }
 0x1ab   : > { %742 = vmatmul.msk.bf16.vlgmr.msra.gmra.mxu1 %vm466_vm0, %v524_v48 }
 0x228   : > { %v557_v52 = vpop.f32.mrf.mxu1 }
 0x229   : > { %v558_v53 = vadd.f32 %v784_v51, %v557_v52 }
 0x22b   : > { %v561_v54 = vmax.f32 %v558_v53, 0.0 }
 0x22d   : > { %v562_v55 = vpack.c.bf16 %v561_v54, %v561_v54 }
 0x22f   : > { %759 = vmatmul.msk.bf16.vlgmr.msra.gmra.mxu2 %vm599_vm6, %v562_v55 }
 0x230   : > { %v559_v56 = vpop.f32.mrf.mxu1 }
 0x2b2   : > { %v612_v58 = vpop.f32.mrf.mxu2 }
 0x2b3   : > { %v613_v59 = vadd.f32 %v785_v57, %v612_v58 }
 0x2b5   : > { %v616_v60 = vmul.f32 %v920_v9, %v613_v59 }
 0x2b7   : > { %v617_v61 = vadd.f32 %v616_v60, %v923_v14  ;;  %v786_v14 = vld [vmem:[%s995_s11] ss:$0 sm:$0xff] }
 0x2b9   : > { %v620_v62 = vsel %vm466_vm0, %v617_v61, 0.0 }
 0x2ba   : > { %v614_v63 = vpop.f32.mrf.mxu2  ;;  %621 = vadd.xlane.f32.xlu1 %v620_v62 }
 0x32d   : > { %v622_v0 = vpop.xlane.xlu1 %621 }
 0x32e   : > { %v623_v1 = vmul.f32 %v622_v0, %v927_v23 }
 0x330   : > { %v624_v2 = vsub.f32 %v617_v61, %v623_v1 }
 0x332   : > { %v625_v3 = vmul.f32 %v624_v2, %v624_v2 }
 0x334   : > { %v626_v4 = vsel %vm466_vm0, %v625_v3, 0.0 }
 0x335   : > { %627 = vadd.xlane.f32.xlu1 %v626_v4 }
 0x3a8   : > { %v628_v5 = vpop.xlane.xlu1 %627 }
 0x3a9   : > { %v629_v6 = vmul.f32 %v628_v5, %v927_v23 }
 0x3ab   : > { %v630_v7 = vadd.f32 1e-05, %v629_v6 }
 0x3ad   : > { %792 = vrsqrt.f32 %v630_v7  ;;  %vm637_vm8 = vweird.f32 %v630_v7 }
 0x3b3   : > { %v793_v8 = vpop.eup %792 }
 0x3b4   : > { %v632_v9 = vmul.f32 %v793_v8, %v630_v7  ;;  %vm638_vm7 = vweird.f32 %v793_v8 }
 0x3b5   : > { %vm639_vm9 = vmor %vm637_vm8, %vm638_vm7 }
 0x3b6   : > { %v633_v10 = vmul.f32 %v793_v8, %v632_v9 }
 0x3b8   : > { %v634_v11 = vmul.f32 0.5, %v633_v10 }
 0x3ba   : > { %v635_v12 = vsub.f32 1.5, %v634_v11 }
 0x3bc   : > { %v636_v13 = vmul.f32 %v793_v8, %v635_v12 }
 0x3be   : > { %v640_v15 = vsel %vm639_vm9, %v793_v8, %v636_v13 }
 0x3bf   : > { %v641_v17 = vmul.f32 %v640_v15, %v624_v2 }
 0x3c1   : > { %v645_v18 = vmul.f32 %v786_v14, %v641_v17 }
 0x3c3   : > { %v649_v19 = vadd.f32 %v787_v16, %v645_v18 }
 0x3c5   : > { %650 = vst.msk [vmem:[%s434_s22] sm:$0xff] %vm466_vm0, %v649_v19 }
 0x3c6 PF: > { %s31_s29 = sadd.s32 1, %s814_s29  }
 0x3c7   : > { %p28_p4 = scmp.ge.s32.totalorder %s31_s29, 4  }
 0x3c9   :  { %30 = sbr.rel (!%p28_p4) target bundleno = 7 (0x7), region = 101 }

// kernel: encoder_blocks_forward.9
= control target key start
LH: loop header
LB: loop body
LE: loop exit
PB: predicated region body
PF: predicated region fallthrough
CT: control target
= control target key end

     0   :  { %s615_s18 = smov [#allocation3]   ;;  %s702_s0 = inlined_call_operand.vmem [shape: s32[2], index: 0, kind: input, shape index: {}]   ;;  %s703_s1 = inlined_call_operand.vmem [shape: f32[2,4,8,8], index: 1, kind: input, shape index: {}]   ;;  %s704_s2 = inlined_call_operand.vmem [shape: f32[2,4,8,8], index: 2, kind: input, shape index: {}]   ;;  %s705_s3 = inlined_call_operand.vmem [shape: f32[2,4,8,8], index: 3, kind: input, shape index: {}]   ;;  %s706_s4 = inlined_call_operand.vmem [shape: f32[2,4,8,8], index: 4, kind: output, shape index: {}]  }
   0x1   :  { %s10_s17 = sshll.u32 %s702_s0, 4  ;;  %s11_s17 = int_to_ptr.vmem [resolvable:$true] %s10_s17 }
   0x2   :  { %13 = dma.vmem_to_smem %s11_s17, 16, %s615_s18, [#allocation2] }
   0x3   :  { %609 = dma.done.wait [#allocation2], 16 }
   0x4   :  { %610 = vsyncadd [#allocation2], 4294967280 }
   0x5   :  { %16 = sfence }
   0x6   :  { %s644_s19 = smov 0  }
   0x7 LB: > { %s650_s20 = sadd.s32 4294967295, %s613_s19   ;;  %p545_p0 = scmp.ge.s32.totalorder %s613_s19, 1  ;;  %s613_s19 = sphi %s644_s19, %s22_s19  }
   0x8   : > { %p166_p1 = scmp.lt.s32.totalorder %s613_s19, 3 }
   0xa   : > { %p167_p2 = pnand %p545_p0, %p166_p1 }
   0xb   : > { %p200_p3 = scmp.lt.s32.totalorder (!%p167_p2), %s650_s20, 1  ;;  %s324_s28 = sld [smem:[#allocation3 + %s650_s20]] (!%p167_p2) }
   0xc   : > { %170 = sbr.rel (%p167_p2) target bundleno = 569 (0x239), region = 32 }
  0x11   : > { %s201_s0 = scalar_select %p200_p3, %s650_s20, 1  ;;  %vm245_vm0 = vcmask 64512   ;;  %v322_v20 = vlaneseq  ;;  %v325_v22 = vstv %s324_s28  ;;  %vm384_vm2 = vcmask 1043456  }
  0x13   : > { %s656_s21 = sshll.u32 %s201_s0, 5  ;;  %v323_v21 = vand.u32 127, %v322_v20 }
  0x14   : > { %s209_s24 = scalar_lea.vmem %s704_s2, %s656_s21  ;;  %s204_s27 = scalar_lea.vmem %s703_s1, %s656_s21 }
  0x15   : > { %v229_v0 = vld [vmem:[%s209_s24] sm:$0xff]  ;;  %v231_v1 = vld [vmem:[%s209_s24 + $0x10] sm:$0xff]  ;;  %v232_v2 = vld [vmem:[%s209_s24 + $0x18] sm:$0xff]  ;;  %vm326_vm1 = vcmp.ge.s32.totalorder %v323_v21, %v325_v22  ;;  %s214_s5 = scalar_lea.vmem %s705_s3, %s656_s21  ;;  %s219_s8 = scalar_lea.vmem %s706_s4, %s656_s21 }
  0x16   : > { %v233_v3 = vpack.c.bf16 %v229_v0, %v229_v0  ;;  %v235_v4 = vpack.c.bf16 %v231_v1, %v231_v1  ;;  %v236_v5 = vpack.c.bf16 %v232_v2, %v232_v2  ;;  %v230_v6 = vld [vmem:[%s209_s24 + $0x8] sm:$0xff]  ;;  %v221_v11 = vld [vmem:[%s204_s27] sm:$0xff]  ;;  %v223_v12 = vld [vmem:[%s204_s27 + $0x10] sm:$0xff] }
  0x17   : > { %v234_v10 = vpack.c.bf16 %v230_v6, %v230_v6  ;;  %v224_v13 = vld [vmem:[%s204_s27 + $0x18] sm:$0xff]  ;;  %v222_v15 = vld [vmem:[%s204_s27 + $0x8] sm:$0xff]  ;;  %v225_v16 = vpack.c.bf16 %v221_v11, %v221_v11  ;;  %v227_v17 = vpack.c.bf16 %v223_v12, %v223_v12  ;;  %v237_v59 = vld [vmem:[%s214_s5] sm:$0xff] }
  0x18   : > { %v250_v7 = vsel %vm245_vm0, %v233_v3, 0  ;;  %v288_v8 = vsel %vm245_vm0, %v235_v4, 0  ;;  %v307_v9 = vsel %vm245_vm0, %v236_v5, 0  ;;  %v228_v18 = vpack.c.bf16 %v224_v13, %v224_v13  ;;  %v239_v62 = vld [vmem:[%s214_s5 + $0x10] sm:$0xff]  ;;  %v238_v0 = vld [vmem:[%s214_s5 + $0x8] sm:$0xff]  ;;  %v240_v4 = vld [vmem:[%s214_s5 + $0x18] sm:$0xff] }
  0x19   : > { %259 = vmatpush.bf16.xpose.msra.mxu0 %v250_v7  ;;  %297 = vmatpush.bf16.xpose.msra.mxu2 %v288_v8  ;;  %v269_v14 = vsel %vm245_vm0, %v234_v10, 0  ;;  %v226_v19 = vpack.c.bf16 %v222_v15, %v222_v15  ;;  %v241_v60 = vpack.c.bf16 %v237_v59, %v237_v59  ;;  %v243_v63 = vpack.c.bf16 %v239_v62, %v239_v62 }
  0x1a   : > { %316 = vmatpush.bf16.xpose.msra.mxu3 %v307_v9  ;;  %278 = vmatpush.bf16.xpose.msra.mxu1 %v269_v14  ;;  %v242_v2 = vpack.c.bf16 %v238_v0, %v238_v0  ;;  %v244_v5 = vpack.c.bf16 %v240_v4, %v240_v4 }
  0x1b   : > { %v386_v61 = vsel %vm384_vm2, %v241_v60, 0  ;;  %v424_v1 = vsel %vm384_vm2, %v243_v63, 0 }
  0x1c   : > { %v405_v3 = vsel %vm384_vm2, %v242_v2, 0  ;;  %v443_v6 = vsel %vm384_vm2, %v244_v5, 0 }
  0x20   : > { %554 = vmatmul.msk.bf16.vlgmr.msra.gmra.mxu0 %vm245_vm0, %v225_v16  ;;  %556 = vmatmul.msk.bf16.vlgmr.msra.gmra.mxu2 %vm245_vm0, %v227_v17 }
  0x21   : > { %557 = vmatmul.msk.bf16.vlgmr.msra.gmra.mxu3 %vm245_vm0, %v228_v18  ;;  %555 = vmatmul.msk.bf16.vlgmr.msra.gmra.mxu1 %vm245_vm0, %v226_v19 }
  0x22   : > { %395 = vmatpush.bf16.msrb.mxu0 %v386_v61  ;;  %433 = vmatpush.bf16.msrb.mxu2 %v424_v1 }
  0x23   : > { %414 = vmatpush.bf16.msrb.mxu1 %v405_v3  ;;  %452 = vmatpush.bf16.msrb.mxu3 %v443_v6 }
  0x9d   : > { %v261_v23 = vpop.f32.mrf.mxu0 }
  0x9e   : > { %v329_v24 = vsel %vm326_vm1, -1e+30, %v261_v23  ;;  %v280_v26 = vpop.f32.mrf.mxu1 }
  0x9f   : > { %v333_v25 = vsel %vm245_vm0, %v329_v24, -inf  ;;  %v330_v27 = vsel %vm326_vm1, -1e+30, %v280_v26 }
  0xa0   : > { %334 = vmax.xlane.f32.xlu1 %v333_v25  ;;  %v336_v32 = vsel %vm245_vm0, %v330_v27, -inf }
  0xa3   : > { %v299_v28 = vpop.f32.mrf.mxu2 }
  0xa4   : > { %v331_v29 = vsel %vm326_vm1, -1e+30, %v299_v28  ;;  %v318_v30 = vpop.f32.mrf.mxu3 }
  0xa5   : > { %v339_v31 = vsel %vm245_vm0, %v331_v29, -inf  ;;  %v263_v33 = vpop.f32.mrf.mxu0  ;;  %v332_v35 = vsel %vm326_vm1, -1e+30, %v318_v30 }
  0xa6   : > { %340 = vmax.xlane.f32.xlu0 %v339_v31  ;;  %v282_v34 = vpop.f32.mrf.mxu1  ;;  %v342_v37 = vsel %vm245_vm0, %v332_v35, -inf }
  0xa8   : > { %337 = vmax.xlane.f32.xlu1 %v336_v32 }
  0xab   : > { %v301_v36 = vpop.f32.mrf.mxu2 }
  0xac   : > { %v320_v38 = vpop.f32.mrf.mxu3 }
  0xae   : > { %343 = vmax.xlane.f32.xlu0 %v342_v37 }
 0x113   : > { %v335_v39 = vpop.xlane.xlu1 %334 }
 0x114   : > { %v345_v40 = vsub.f32 %v329_v24, %v335_v39 }
 0x116   : > { %v349_v41 = vmul.f32 1.442695, %v345_v40 }
 0x118   : > { %577 = vpow2.f32 %v349_v41 }
 0x119   : > { %v341_v42 = vpop.xlane.xlu0 %340 }
 0x11a   : > { %v347_v43 = vsub.f32 %v331_v29, %v341_v42 }
 0x11b   : > { %v338_v44 = vpop.xlane.xlu1 %337 }
 0x11c   : > { %v353_v45 = vmul.f32 1.442695, %v347_v43  ;;  %v346_v46 = vsub.f32 %v330_v27, %v338_v44 }
 0x11e   : > { %v578_v47 = vpop.eup %577  ;;  %579 = vpow2.f32 %v353_v45  ;;  %v351_v48 = vmul.f32 1.442695, %v346_v46 }
 0x11f   : > { %v357_v49 = vsel %vm245_vm0, %v578_v47, 0.0 }
 0x120   : > { %581 = vpow2.f32 %v351_v48  ;;  %358 = vadd.xlane.f32.xlu0 %v357_v49 }
 0x121   : > { %v344_v50 = vpop.xlane.xlu0 %343 }
 0x122   : > { %v348_v51 = vsub.f32 %v332_v35, %v344_v50 }
 0x124   : > { %v580_v52 = vpop.eup %579  ;;  %v355_v53 = vmul.f32 1.442695, %v348_v51 }
 0x125   : > { %v363_v54 = vsel %vm245_vm0, %v580_v52, 0.0 }
 0x126   : > { %v582_v55 = vpop.eup %581  ;;  %583 = vpow2.f32 %v355_v53  ;;  %364 = vadd.xlane.f32.xlu2 %v363_v54 }
 0x127   : > { %v360_v56 = vsel %vm245_vm0, %v582_v55, 0.0 }
 0x128   : > { %361 = vadd.xlane.f32.xlu1 %v360_v56 }
 0x12c   : > { %v584_v57 = vpop.eup %583 }
 0x12d   : > { %v366_v58 = vsel %vm245_vm0, %v584_v57, 0.0 }
 0x12e   : > { %367 = vadd.xlane.f32.xlu2 %v366_v58 }
 0x193   : > { %v359_v7 = vpop.xlane.xlu0 %358 }
 0x194   : > { %585 = vrcp.f32 %v359_v7 }
 0x199   : > { %v365_v8 = vpop.xlane.xlu2 %364 }
 0x19a   : > { %v586_v9 = vpop.eup %585  ;;  %587 = vrcp.f32 %v365_v8 }
 0x19b   : > { %v373_v10 = vmul.f32 %v586_v9, %v578_v47  ;;  %v362_v11 = vpop.xlane.xlu1 %361 }
 0x19c   : > { %589 = vrcp.f32 %v362_v11 }
 0x19d   : > { %v377_v12 = vpack.c.bf16 %v373_v10, %v373_v10 }
 0x19f   : > { %558 = vmatmul.msk.bf16.vlgmr.msrb.gmra.mxu0 %vm245_vm0, %v377_v12 }
 0x1a0   : > { %v588_v13 = vpop.eup %587 }
 0x1a1   : > { %v375_v14 = vmul.f32 %v588_v13, %v580_v52  ;;  %v368_v15 = vpop.xlane.xlu2 %367 }
 0x1a2   : > { %v590_v16 = vpop.eup %589  ;;  %591 = vrcp.f32 %v368_v15 }
 0x1a3   : > { %v374_v17 = vmul.f32 %v590_v16, %v582_v55  ;;  %v379_v18 = vpack.c.bf16 %v375_v14, %v375_v14 }
 0x1a5   : > { %v378_v19 = vpack.c.bf16 %v374_v17, %v374_v17  ;;  %560 = vmatmul.msk.bf16.vlgmr.msrb.gmra.mxu2 %vm245_vm0, %v379_v18 }
 0x1a7   : > { %559 = vmatmul.msk.bf16.vlgmr.msrb.gmra.mxu1 %vm245_vm0, %v378_v19 }
 0x1a8   : > { %v592_v20 = vpop.eup %591 }
 0x1a9   : > { %v376_v21 = vmul.f32 %v592_v20, %v584_v57 }
 0x1ab   : > { %v380_v22 = vpack.c.bf16 %v376_v21, %v376_v21 }
 0x1ad   : > { %561 = vmatmul.msk.bf16.vlgmr.msrb.gmra.mxu3 %vm245_vm0, %v380_v22 }
 0x21c   : > { %v397_v23 = vpop.f32.mrf.mxu0 }
 0x21d   : > { %458 = vst.msk [vmem:[%s219_s8] sm:$0xff] %vm245_vm0, %v397_v23 }
 0x224   : > { %v399_v24 = vpop.f32.mrf.mxu0  ;;  %v416_v25 = vpop.f32.mrf.mxu1 }
 0x225   : > { %459 = vst.msk [vmem:[%s219_s8 + $0x8] sm:$0xff] %vm245_vm0, %v416_v25 }
 0x228   : > { %v435_v26 = vpop.f32.mrf.mxu2 }
 0x229   : > { %460 = vst.msk [vmem:[%s219_s8 + $0x10] sm:$0xff] %vm245_vm0, %v435_v26 }
 0x22c   : > { %v418_v27 = vpop.f32.mrf.mxu1 }
 0x230   : > { %v437_v28 = vpop.f32.mrf.mxu2  ;;  %v454_v29 = vpop.f32.mrf.mxu3 }
 0x231   : > { %461 = vst.msk [vmem:[%s219_s8 + $0x18] sm:$0xff] %vm245_vm0, %v454_v29 }
 0x238   : > { %v456_v30 = vpop.f32.mrf.mxu3 }
 0x239 PF: > { %s22_s19 = sadd.s32 1, %s613_s19  }
 0x23a   : > { %p19_p4 = scmp.ge.s32.totalorder %s22_s19, 4  }
 0x23c   :  { %21 = sbr.rel (!%p19_p4) target bundleno = 7 (0x7), region = 68 }

// kernel: encoder_blocks_forward.13
= control target key start
LH: loop header
LB: loop body
LE: loop exit
PB: predicated region body
PF: predicated region fallthrough
CT: control target
= control target key end

     0   :  { %s926_s28 = smov [#allocation3]   ;;  %s1158_s0 = inlined_call_operand.vmem [shape: s32[2], index: 0, kind: input, shape index: {}]   ;;  %s1159_s1 = inlined_call_operand.vmem [shape: f32[2,8,32], index: 1, kind: input, shape index: {}]   ;;  %s1160_s2 = inlined_call_operand.vmem [shape: f32[2,8,32], index: 2, kind: input, shape index: {}]   ;;  %s1161_s3 = inlined_call_operand.vmem [shape: bf16[32,32], index: 3, kind: input, shape index: {}]   ;;  %s1162_s4 = inlined_call_operand.vmem [shape: f32[1,32], index: 4, kind: input, shape index: {}]   ;;  %s1163_s5 = inlined_call_operand.vmem [shape: f32[1,32], index: 5, kind: input, shape index: {}]   ;;  %s1164_s6 = inlined_call_operand.vmem [shape: f32[1,32], index: 6, kind: input, shape index: {}]   ;;  %s1165_s7 = inlined_call_operand.vmem [shape: bf16[32,64], index: 7, kind: input, shape index: {}]   ;;  %s1166_s8 = inlined_call_operand.vmem [shape: f32[1,64], index: 8, kind: input, shape index: {}]   ;;  %s1167_s9 = inlined_call_operand.vmem [shape: bf16[64,32], index: 9, kind: input, shape index: {}]   ;;  %s1168_s10 = inlined_call_operand.vmem [shape: f32[1,32], index: 10, kind: input, shape index: {}]   ;;  %s1169_s11 = inlined_call_operand.vmem [shape: f32[1,32], index: 11, kind: input, shape index: {}]   ;;  %s1170_s12 = inlined_call_operand.vmem [shape: f32[1,32], index: 12, kind: input, shape index: {}]   ;;  %s1171_s13 = inlined_call_operand.hbm [shape: f32[2,8,32], index: 13, kind: output, shape index: {}]  }
   0x1   :  { %1172 = sst [smem:[#allocation8_spill]] %s1159_s1  ;;  %s19_s27 = sshll.u32 %s1158_s0, 4  ;;  %s20_s27 = int_to_ptr.vmem [resolvable:$true] %s19_s27 }
   0x2   :  { %1173 = sst [smem:[#allocation9_spill]] %s1160_s2 }
   0x3   :  { %1174 = sst [smem:[#allocation10_spill]] %s1161_s3 }
   0x4   :  { %22 = dma.vmem_to_smem %s20_s27, 16, %s926_s28, [#allocation2] }
   0x5   :  { %904 = dma.done.wait [#allocation2], 16 }
   0x6   :  { %905 = vsyncadd [#allocation2], 4294967280 }
   0x7   :  { %25 = sfence }
   0x8   :  { %26 = vsyncpa [#allocation5], 0 }
   0x9   :  { %28 = vsyncpa [#allocation5 + $0x1], 0  ;;  %s1002_s29 = smov 0   ;;  %s1004_s30 = smov 0  }
   0xa   :  { %s1006_s14 = smov 0   ;;  %s1008_s15 = smov 0  }
   0xb LB: > { %s1023_s0 = sadd.s32 4294967295, %s924_s15   ;;  %s738_s16 = sadd.s32 4294967294, %s924_s15   ;;  %s924_s15 = sphi %s1008_s15, %s1183_s15   ;;  %s920_s14 = sphi %s1006_s14, %s1182_s14   ;;  %s916_s30 = sphi %s1004_s30, %s1181_s30   ;;  %s912_s29 = sphi %s1002_s29, %s1180_s29  }
   0xc   : > { %s1027_s17 = sadd.s32 1, %s924_s15   ;;  %s303_s18 = sadd.s32 1, %s920_s14 }
   0xd   : > { %s300_s19 = ssub.s32 %s924_s15, %s1027_s17  ;;  %p313_p0 = scmp.ne.s32.totalorder %s920_s14, %s916_s30 }
   0xe   : > { %p301_p1 = scmp.eq.s32.totalorder %s300_s19, 0  ;;  %p314_p2 = scmp.eq.s32.totalorder %s1023_s0, 1 }
   0xf   : > { %p319_p3 = scmp.ne.s32.totalorder %s916_s30, %s912_s29  ;;  %p320_p4 = scmp.eq.s32.totalorder %s738_s16, 1 }
  0x10   : > { %s1038_s20 = scalar_select %p301_p1, %s920_s14, %s303_s18  }
  0x11   : > { %p1040_p5 = por %p314_p2, %p313_p0  ;;  %p1044_p6 = por %p320_p4, %p319_p3 }
  0x12   : > { %p741_p7 = scmp.ge.s32.totalorder %s924_s15, 1  ;;  %p382_p8 = scmp.lt.s32.totalorder %s924_s15, 3 }
  0x14   : > { %p383_p9 = pnand %p741_p7, %p382_p8 }
  0x15   : > { %s1177_s3 = sld [smem:[#allocation10_spill]] (!%p383_p9)  ;;  %p427_p10 = scmp.lt.s32.totalorder (!%p383_p9), %s1023_s0, 1 }
  0x16   : > { %386 = sbr.rel (%p383_p9) target bundleno = 978 (0x3d2), region = 68  ;;  %s1178_s1 = sld [smem:[#allocation8_spill]] (!%p383_p9) }
  0x17   : > { %s441_s23 = sld [smem:[#allocation3 + %s1023_s0]] (!%p383_p9)  ;;  %s782_s24 = sshll.u32 (!%p383_p9), %s1023_s0, 3 }
  0x18   : > { %s1179_s2 = sld [smem:[#allocation9_spill]] (!%p383_p9) }
  0x1b   : > { %v786_v0 = vld [vmem:[%s1177_s3 + $0x8] sm:$0xff]  ;;  %v785_v1 = vld [vmem:[%s1177_s3] sm:$0xff]  ;;  %s428_s27 = scalar_select %p427_p10, %s1023_s0, 1  ;;  %vm466_vm0 = vcmask 261120   ;;  %v439_v4 = vlaneseq  ;;  %v927_v8 = vmov 0.0   ;;  %v928_v17 = vmov 32.0  }
  0x1c   : > { %476 = vmatpush.bf16.msra.mxu0 %v786_v0  ;;  %v835_v7 = vld [vmem:[%s1162_s4] ss:$0 sm:$0xff]  ;;  %842 = vrcp.f32 %v928_v17  ;;  %v788_v29 = vld [vmem:[%s1165_s7 + $0x8] sm:$0xff]  ;;  %v792_v31 = vld [vmem:[%s1167_s9 + $0x18] sm:$0xff]  ;;  %vm599_vm6 = vcmask 523264  }
  0x1d   : > { %s743_s28 = sshll.u32 %s428_s27, 3  ;;  %v440_v5 = vshrl.u32 %v439_v4, 7  ;;  %v442_v6 = vstv %s441_s23  ;;  %554 = vmatpush.bf16.msra.mxu1 %v788_v29  ;;  %v787_v30 = vld [vmem:[%s1165_s7] sm:$0xff]  ;;  %607 = vmatpush.bf16.msra.mxu2 %v792_v31  ;;  %v791_v34 = vld [vmem:[%s1167_s9 + $0x10] sm:$0xff]  ;;  %v790_v49 = vld [vmem:[%s1167_s9 + $0x8] sm:$0xff] }
  0x1e   : > { %s430_s19 = scalar_lea.vmem %s1178_s1, %s743_s28  ;;  %s434_s16 = scalar_lea.vmem %s1179_s2, %s743_s28  ;;  %v836_v42 = vld [vmem:[%s1163_s5] ss:$0 sm:$0xff] }
  0x1f   : > { %v437_v2 = vld [vmem:[%s430_s19] sm:$0xff]  ;;  %vm443_vm1 = vcmp.lt.s32.totalorder %v440_v5, %v442_v6  ;;  %s424_s19 = sand.u32 1, %s916_s30   ;;  %s662_s28 = scalar_lea.hbm %s1171_s13, %s782_s24 }
  0x20   : > { %477 = vmatpush.bf16.msra.mxu0 %v785_v1  ;;  %v438_v3 = vpack.c.bf16 %v437_v2, %v437_v2  ;;  %v1069_v9 = vsel %vm443_vm1, 1.0, %v927_v8  ;;  %v436_v12 = vld [vmem:[%s434_s16] sm:$0xff]  ;;  %s742_s23 = sshll.u32 %s424_s19, 3  ;;  %s666_s3 = sshll.u32 %s662_s28, 4  ;;  %s667_s3 = int_to_ptr.hbm [resolvable:$true] %s666_s3 }
  0x21   : > { %555 = vmatpush.bf16.msra.mxu1 %v787_v30  ;;  %608 = vmatpush.bf16.msra.mxu2 %v791_v34  ;;  %v837_v45 = vld [vmem:[%s1164_s6] ss:$0 sm:$0xff]  ;;  %s426_s2 = scalar_lea.vmem [#allocation4], %s742_s23  ;;  %s652_s25 = scalar_lea.sflag [#allocation5], %s424_s19 }
  0x22   : > { %v843_v18 = vpop.eup %842  ;;  %v789_v50 = vld [vmem:[%s1167_s9] sm:$0xff]  ;;  %s664_s0 = sshll.u32 %s426_s2, 4  ;;  %s874_s26 = sshra.s32 %s667_s3, 4  ;;  %s665_s0 = int_to_ptr.vmem [resolvable:$true] %s664_s0  ;;  %s875_s26 = int_to_ptr.hbm [resolvable:$true] %s874_s26 }
  0x23   : > { %754 = vmatmul.msk.bf16.vlgmr.msra.gmra.mxu0 %vm466_vm0, %v438_v3  ;;  %v491_v19 = vmul.f32 32.0, %v843_v18  ;;  %vm495_vm2 = vweird.f32 %v843_v18  ;;  %v838_v51 = vld [vmem:[%s1166_s8] ss:$0 sm:$0xff]  ;;  %s876_s24 = scalar_lea.hbm %s875_s26, 8  ;;  %s880_s23 = scalar_lea.hbm %s1171_s13, 16 }
  0x24   : > { %v839_v57 = vld [vmem:[%s1168_s10] ss:$0 sm:$0xff]  ;;  %p877_p11 = scmp.ne.s32.totalorder %s875_s26, %s876_s24  ;;  %p881_p0 = scmp.lt.s32.totalorder %s875_s26, %s1171_s13 }
  0x25   : > { %v492_v20 = vsub.f32 1.0, %v491_v19  ;;  %609 = vmatpush.bf16.msra.mxu2 %v790_v49  ;;  %v841_v17 = vld [vmem:[%s1170_s12] ss:$0 sm:$0xff]  ;;  %p882_p1 = scmp.lt.s32.totalorder %s880_s23, %s876_s24 }
  0x26   : > { %p878_p12 = pnand %p877_p11, %p1040_p5 }
  0x27   : > { %v493_v21 = vmul.f32 %v843_v18, %v492_v20  ;;  %p883_p2 = por %p882_p1, %p881_p0 }
  0x28   : > { %p879_p13 = pneg %p878_p12 }
  0x29   : > { %v494_v22 = vadd.f32 %v843_v18, %v493_v21  ;;  %610 = vmatpush.bf16.msra.mxu2 %v789_v50 }
  0x2a   : > { %p884_p3 = pnand %p883_p2, %p879_p13 }
  0x2b   : > { %v1076_v23 = vsel %vm495_vm2, %v843_v18, %v494_v22 }
  0xa0   : > { %v479_v10 = vpop.f32.mrf.mxu0 }
  0xa1   : > { %v480_v11 = vadd.f32 %v835_v7, %v479_v10 }
  0xa3   : > { %v483_v13 = vmul.f32 %v1069_v9, %v480_v11 }
  0xa5   : > { %v1072_v14 = vadd.f32 %v483_v13, %v436_v12 }
  0xa7   : > { %v487_v15 = vsel %vm466_vm0, %v1072_v14, 0.0 }
  0xa8   : > { %v481_v16 = vpop.f32.mrf.mxu0  ;;  %488 = vadd.xlane.f32.xlu0 %v487_v15 }
 0x11b   : > { %v489_v24 = vpop.xlane.xlu0 %488 }
 0x11c   : > { %v497_v25 = vmul.f32 %v1076_v23, %v489_v24 }
 0x11e   : > { %v498_v26 = vsub.f32 %v1072_v14, %v497_v25 }
 0x120   : > { %v499_v27 = vmul.f32 %v498_v26, %v498_v26 }
 0x122   : > { %v500_v28 = vsel %vm466_vm0, %v499_v27, 0.0 }
 0x123   : > { %501 = vadd.xlane.f32.xlu0 %v500_v28 }
 0x196   : > { %v502_v32 = vpop.xlane.xlu0 %501 }
 0x197   : > { %v503_v33 = vmul.f32 %v502_v32, %v1076_v23 }
 0x199   : > { %v504_v35 = vadd.f32 1e-05, %v503_v33 }
 0x19b   : > { %844 = vrsqrt.f32 %v504_v35  ;;  %vm511_vm4 = vweird.f32 %v504_v35 }
 0x1a1   : > { %v845_v36 = vpop.eup %844 }
 0x1a2   : > { %v506_v37 = vmul.f32 %v845_v36, %v504_v35  ;;  %vm512_vm3 = vweird.f32 %v845_v36 }
 0x1a3   : > { %vm513_vm5 = vmor %vm511_vm4, %vm512_vm3 }
 0x1a4   : > { %v507_v38 = vmul.f32 %v845_v36, %v506_v37 }
 0x1a6   : > { %v508_v39 = vmul.f32 0.5, %v507_v38 }
 0x1a8   : > { %v509_v40 = vsub.f32 1.5, %v508_v39 }
 0x1aa   : > { %v510_v41 = vmul.f32 %v845_v36, %v509_v40 }
 0x1ac   : > { %v514_v43 = vsel %vm513_vm5, %v845_v36, %v510_v41 }
 0x1ad   : > { %v515_v44 = vmul.f32 %v514_v43, %v498_v26 }
 0x1af   : > { %v519_v46 = vmul.f32 %v836_v42, %v515_v44 }
 0x1b1   : > { %v523_v47 = vadd.f32 %v837_v45, %v519_v46 }
 0x1b3   : > { %v524_v48 = vpack.c.bf16 %v523_v47, %v523_v47 }
 0x1b5   : > { %763 = vmatmul.msk.bf16.vlgmr.msra.gmra.mxu1 %vm466_vm0, %v524_v48 }
 0x232   : > { %v557_v52 = vpop.f32.mrf.mxu1 }
 0x233   : > { %v558_v53 = vadd.f32 %v838_v51, %v557_v52 }
 0x235   : > { %v561_v54 = vmax.f32 %v558_v53, 0.0 }
 0x237   : > { %v562_v55 = vpack.c.bf16 %v561_v54, %v561_v54 }
 0x239   : > { %780 = vmatmul.msk.bf16.vlgmr.msra.gmra.mxu2 %vm599_vm6, %v562_v55 }
 0x23a   : > { %v559_v56 = vpop.f32.mrf.mxu1 }
 0x2bc   : > { %v612_v58 = vpop.f32.mrf.mxu2 }
 0x2bd   : > { %v613_v59 = vadd.f32 %v839_v57, %v612_v58 }
 0x2bf   : > { %v616_v60 = vmul.f32 %v1069_v9, %v613_v59 }
 0x2c1   : > { %v617_v61 = vadd.f32 %v616_v60, %v1072_v14  ;;  %v840_v14 = vld [vmem:[%s1169_s11] ss:$0 sm:$0xff] }
 0x2c3   : > { %v620_v62 = vsel %vm466_vm0, %v617_v61, 0.0 }
 0x2c4   : > { %v614_v63 = vpop.f32.mrf.mxu2  ;;  %621 = vadd.xlane.f32.xlu1 %v620_v62 }
 0x337   : > { %v622_v0 = vpop.xlane.xlu1 %621 }
 0x338   : > { %v623_v1 = vmul.f32 %v622_v0, %v1076_v23 }
 0x33a   : > { %v624_v2 = vsub.f32 %v617_v61, %v623_v1 }
 0x33c   : > { %v625_v3 = vmul.f32 %v624_v2, %v624_v2 }
 0x33e   : > { %v626_v4 = vsel %vm466_vm0, %v625_v3, 0.0 }
 0x33f   : > { %627 = vadd.xlane.f32.xlu1 %v626_v4 }
 0x3b2   : > { %v628_v5 = vpop.xlane.xlu1 %627 }
 0x3b3   : > { %v629_v6 = vmul.f32 %v628_v5, %v1076_v23 }
 0x3b5   : > { %v630_v7 = vadd.f32 1e-05, %v629_v6 }
 0x3b7   : > { %846 = vrsqrt.f32 %v630_v7  ;;  %vm637_vm8 = vweird.f32 %v630_v7 }
 0x3bd   : > { %v847_v8 = vpop.eup %846 }
 0x3be   : > { %v632_v9 = vmul.f32 %v847_v8, %v630_v7  ;;  %vm638_vm7 = vweird.f32 %v847_v8 }
 0x3bf   : > { %vm639_vm9 = vmor %vm637_vm8, %vm638_vm7 }
 0x3c0   : > { %v633_v10 = vmul.f32 %v847_v8, %v632_v9 }
 0x3c2   : > { %v634_v11 = vmul.f32 0.5, %v633_v10 }
 0x3c4   : > { %v635_v12 = vsub.f32 1.5, %v634_v11 }
 0x3c6   : > { %v636_v13 = vmul.f32 %v847_v8, %v635_v12 }
 0x3c8   : > { %v640_v15 = vsel %vm639_vm9, %v847_v8, %v636_v13 }
 0x3c9   : > { %v641_v16 = vmul.f32 %v640_v15, %v624_v2 }
 0x3cb   : > { %v645_v18 = vmul.f32 %v840_v14, %v641_v16 }
 0x3cd   : > { %v649_v19 = vadd.f32 %v841_v17, %v645_v18 }
 0x3cf   : > { %650 = vst.msk [vmem:[%s426_s2] sm:$0xff] %vm466_vm0, %v649_v19 }
 0x3d0   : > { %887 = shalt.err (!%p884_p3)
}
 0x3d1   : > { %793 = dma.vmem_to_hbm [thread:$0]  (%p1040_p5), %s665_s0, 128, %s667_s3, %s652_s25  }
 0x3d2 PF: > { %p799_p4 = scmp.ge.s32.totalorder %s924_s15, 2  ;;  %s678_s2 = sand.u32 1, %s912_s29  }
 0x3d3   : > { %s679_s19 = scalar_lea.sflag [#allocation5], %s678_s2 }
 0x3d4   : > { %p796_p7 = pnand %p799_p4, %p1044_p6 }
 0x3d6   : > { %p797_p8 = pneg %p796_p7 }
 0x3d8   : > { %907 = dma.done.wait (%p797_p8), %s679_s19, 128  }
 0x3d9   : > { %909 = vsyncadd (%p797_p8), %s679_s19, 4294967168  ;;  %p31_p9 = scmp.ge.s32.totalorder %s1027_s17, 4   ;;  %s1180_s29 = smov %s916_s30 }
 0x3da   : > { %s1181_s30 = smov %s920_s14  ;;  %s1182_s14 = smov %s1038_s20 }
 0x3db   : > { %s1183_s15 = smov %s1027_s17  ;;  %33 = sbr.rel (!%p31_p9) target bundleno = 11 (0xb), region = 106 }
 0x3e0   :  { %685 = vsyncpa [#allocation5], 1 }
 0x3e1   :  { %687 = vsyncpa [#allocation5 + $0x1], 1 }

</bundles_post_ra>
